<compile_context>
chip_gen: v7x
topology: tpu7x:2x2x1
jax: 0.10.0
libtpu: 0.0.40
codegen_flags: <defaults>
</compile_context>

<pallas_src>
import jax
import jax.numpy as jnp
from jax.experimental import pallas as pl
from jax.experimental.pallas import tpu as pltpu


def _round_up(x, m):
    return ((x + m - 1) // m) * m


def make_decoder_kernel(n_layers: int, hid_dim: int):
    """Pallas kernel body for a fixed number of LSTM layers.

    Layout contract (set up by the wrapper):
      * LSTM gate weights are pre-transposed to (K, 4*H) with the PyTorch gate order i,f,g,o
        packed contiguously along the lane axis (4*H == 128 for H == 32 -> one lane-dense block).
      * All matmul weights and the encoder output are bf16; biases / state feed f32 math.
      * The vocab axis of the output projection is padded to a multiple of 128 lanes so the
        prediction store is unmasked and lane-dense.
    """
    H = hid_dim
    bf16 = jnp.bfloat16
    f32 = jnp.float32

    def kernel(emb_ref, h0_ref, c0_ref, enc_ref, *rest):
        # rest = [w_ih_T, w_hh_T, b] * n_layers, wq_T, wo_mix, wo_q,
        #        w_out_attn, w_out_lstm, b_out, pred_ref, h_out_ref, c_out_ref
        n_w = 3 * n_layers
        layer_refs = rest[:n_w]
        (wq_ref, wo_mix_ref, wo_q_ref,
         w_out_attn_ref, w_out_lstm_ref, b_out_ref) = rest[n_w:n_w + 6]
        pred_ref, h_out_ref, c_out_ref = rest[n_w + 6:]

        x = emb_ref[...]                               # (Bp, E) f32; dropout(embedding) == identity (eval)

        # ---- multi-layer LSTM, single time step (PyTorch gate order i, f, g, o) ----
        for l in range(n_layers):
            w_ih = layer_refs[3 * l][...]              # (K_in, 4H) bf16, gates packed on lanes
            w_hh = layer_refs[3 * l + 1][...]          # (H,    4H) bf16
            b = layer_refs[3 * l + 2][...]             # (1,    4H) f32  == b_ih + b_hh
            h_prev = h0_ref[l]                         # (Bp, H) f32
            c_prev = c0_ref[l]                         # (Bp, H) f32

            gates = (jnp.dot(x.astype(bf16), w_ih, preferred_element_type=f32)
                     + jnp.dot(h_prev.astype(bf16), w_hh, preferred_element_type=f32)
                     + b)                              # (Bp, 4H) f32

            sig = jax.nn.sigmoid(gates)                # i, f, o come out of this single EUP pass
            i_g = sig[:, 0 * H:1 * H]
            f_g = sig[:, 1 * H:2 * H]
            g_g = jnp.tanh(gates[:, 2 * H:3 * H])
            o_g = sig[:, 3 * H:4 * H]

            c_new = f_g * c_prev + i_g * g_g           # state math stays f32 (v5e-safe)
            h_new = o_g * jnp.tanh(c_new)

            h_out_ref[l] = h_new
            c_out_ref[l] = c_new
            x = h_new                                  # inter-layer dropout == identity (eval)

        lstm_out = x                                   # (Bp, H) f32

        # ---- torchnlp.nn.Attention(attention_type='general'), output_len == 1 ----
        enc = enc_ref[...].astype(f32)                 # (Bp, S, H); single up-convert from bf16
        q = jnp.dot(lstm_out.astype(bf16), wq_ref[...],
                    preferred_element_type=f32)        # linear_in (no bias), (Bp, H)

        # VPU broadcast-multiply + XLU reduce instead of per-batch MXU micro-matmuls
        scores = jnp.sum(q[:, None, :] * enc, axis=-1)           # (Bp, S)
        scores_max = jnp.max(scores, axis=-1, keepdims=True)
        e = jnp.exp(scores - scores_max)
        inv_denom = pl.reciprocal(jnp.sum(e, axis=-1, keepdims=True), approx=True)
        weights = e * inv_denom                                  # softmax
        mix = jnp.sum(weights[:, :, None] * enc, axis=1)         # (Bp, H)

        # linear_out([mix, q]) without concatenate: two dots into one f32 accumulator
        attn_out = jnp.tanh(
            jnp.dot(mix.astype(bf16), wo_mix_ref[...], preferred_element_type=f32)
            + jnp.dot(q.astype(bf16), wo_q_ref[...], preferred_element_type=f32))   # (Bp, H)

        # ---- out(cat([attn_output, lstm_output], dim=1)) without concatenate ----
        pred_ref[...] = (
            jnp.dot(attn_out.astype(bf16), w_out_attn_ref[...], preferred_element_type=f32)
            + jnp.dot(lstm_out.astype(bf16), w_out_lstm_ref[...], preferred_element_type=f32)
            + b_out_ref[...])                                    # (Bp, Vp) lane-dense unmasked store

    return kernel


def decoder_forward(embedded, h0, c0, enc_out, lstm_params, wq, wo_attn, w_out, b_out):
    """Wrapper: pad/pre-transpose/bf16-cast everything, one pallas_call, slice real rows back out."""
    n_layers, B, H = h0.shape
    V = w_out.shape[0]
    S = enc_out.shape[1]
    E = embedded.shape[1]

    Bp = _round_up(B, 8)        # full sublane group
    Ep = _round_up(E, 8)
    Vp = _round_up(V, 128)      # lane-dense vocab store
    G = 4 * H                   # packed gate block (== 128 lanes for H == 32)

    f32 = jnp.float32
    bf16 = jnp.bfloat16

    # --- activations / state: zero-pad batch rows only, keep the real H lanes ---
    emb_p = jnp.zeros((Bp, Ep), f32).at[:B, :E].set(embedded.astype(f32))
    h0_p = jnp.pad(h0.astype(f32), ((0, 0), (0, Bp - B), (0, 0)))
    c0_p = jnp.pad(c0.astype(f32), ((0, 0), (0, Bp - B), (0, 0)))
    enc_p = jnp.pad(enc_out.astype(f32), ((0, Bp - B), (0, 0), (0, 0))).astype(bf16)   # (Bp, S, H)

    # --- LSTM weights: plain transpose keeps the i,f,g,o gates packed on the 4*H lanes (bf16) ---
    layer_inputs = []
    for l, (w_ih, w_hh, b) in enumerate(lstm_params):
        in_dim = w_ih.shape[1]
        if l == 0 and in_dim != Ep:
            w_ih_t = jnp.zeros((Ep, G), f32).at[:in_dim].set(w_ih.T).astype(bf16)
        else:
            w_ih_t = w_ih.T.astype(bf16)               # (in_dim, 4H)
        w_hh_t = w_hh.T.astype(bf16)                   # (H, 4H)
        b_p = b.astype(f32).reshape(1, G)              # (1, 4H) f32  (b_ih + b_hh folded)
        layer_inputs += [w_ih_t, w_hh_t, b_p]

    # --- attention / output weights: pre-transposed, split into K-halves (concat-free), bf16 ---
    wq_t = wq.T.astype(bf16)                                               # (H, H)
    wo_mix = wo_attn[:, :H].T.astype(bf16)                                 # acts on mix
    wo_q = wo_attn[:, H:].T.astype(bf16)                                   # acts on q
    w_out_attn = jnp.zeros((H, Vp), f32).at[:, :V].set(w_out[:, :H].T).astype(bf16)   # acts on attn_out
    w_out_lstm = jnp.zeros((H, Vp), f32).at[:, :V].set(w_out[:, H:].T).astype(bf16)   # acts on lstm_out
    b_out_p = jnp.zeros((1, Vp), f32).at[:, :V].set(b_out.astype(f32))

    inputs = [emb_p, h0_p, c0_p, enc_p] + layer_inputs + [
        wq_t, wo_mix, wo_q, w_out_attn, w_out_lstm, b_out_p]

    out_shape = (
        jax.ShapeDtypeStruct((Bp, Vp), f32),                 # prediction (padded vocab lanes)
        jax.ShapeDtypeStruct((n_layers, Bp, H), f32),        # h
        jax.ShapeDtypeStruct((n_layers, Bp, H), f32),        # c
    )

    # advisory cost estimate so XLA schedules this custom call against surrounding ops
    flops = 0
    k = Ep
    for _ in range(n_layers):
        flops += 2 * Bp * (k + H) * G
        k = H
    flops += 2 * Bp * H * H                   # q projection
    flops += 2 * 2 * Bp * S * H               # scores + mix
    flops += 2 * 2 * Bp * H * H               # attention linear_out (two halves)
    flops += 2 * 2 * Bp * H * Vp              # output projection (two halves)
    transcendentals = Bp * (n_layers * (G + 2 * H) + H + S + 1)
    in_bytes = sum(int(x.size) * x.dtype.itemsize for x in inputs)
    out_bytes = 4 * (Bp * Vp + 2 * n_layers * Bp * H)

    # actual footprint is ~100 KB; give Mosaic a small, honest VMEM budget (v7x: 64 MiB/core)
    vmem_limit = int(max(2 * 1024 * 1024, 8 * (in_bytes + out_bytes)))

    vmem = pl.BlockSpec(memory_space=pltpu.MemorySpace.VMEM)
    f = pl.pallas_call(
        make_decoder_kernel(n_layers, H),
        out_shape=out_shape,
        in_specs=[vmem] * len(inputs),
        out_specs=(vmem, vmem, vmem),
        compiler_params=pltpu.CompilerParams(vmem_limit_bytes=vmem_limit),
        cost_estimate=pl.CostEstimate(flops=flops,
                                      transcendentals=transcendentals,
                                      bytes_accessed=in_bytes + out_bytes),
    )
    pred_p, h_p, c_p = f(*inputs)
    # slice padded batch rows / vocab lanes back out (hidden lanes were never padded)
    return pred_p[:B, :V], h_p[:, :B, :], c_p[:, :B, :]


def decoder_reference(embedded, h0, c0, enc_out, lstm_params, wq, wo_attn, w_out, b_out):
    """Pure-JAX f32 reference implementing the same semantics as the PyTorch module."""
    n_layers, B, H = h0.shape
    x = embedded
    h_new, c_new = [], []
    for l in range(n_layers):
        w_ih, w_hh, b = lstm_params[l]
        gates = x @ w_ih.T + h0[l] @ w_hh.T + b
        i_g = jax.nn.sigmoid(gates[:, 0 * H:1 * H])
        f_g = jax.nn.sigmoid(gates[:, 1 * H:2 * H])
        g_g = jnp.tanh(gates[:, 2 * H:3 * H])
        o_g = jax.nn.sigmoid(gates[:, 3 * H:4 * H])
        c_l = f_g * c0[l] + i_g * g_g
        h_l = o_g * jnp.tanh(c_l)
        h_new.append(h_l)
        c_new.append(c_l)
        x = h_l
    lstm_out = x
    q = lstm_out @ wq.T
    scores = jnp.einsum('bh,bsh->bs', q, enc_out)
    weights = jax.nn.softmax(scores, axis=-1)
    mix = jnp.einsum('bs,bsh->bh', weights, enc_out)
    attn_out = jnp.tanh(jnp.concatenate([mix, q], axis=-1) @ wo_attn.T)
    pred = jnp.concatenate([attn_out, lstm_out], axis=-1) @ w_out.T + b_out
    return pred, jnp.stack(h_new), jnp.stack(c_new)


if __name__ == "__main__":
    # Small, forward-consistent shapes.
    output_dim = 50      # vocab size
    emb_dim = 16
    hid_dim = 32
    n_layers = 2
    batch = 2
    src_len = 8

    key = jax.random.PRNGKey(0)
    ks = jax.random.split(key, 16)

    def init(k, shape, scale=0.1):
        return (scale * jax.random.normal(k, shape)).astype(jnp.float32)

    # Parameters (deterministic, synthetic).
    emb_table = init(ks[0], (output_dim, emb_dim))
    lstm_params = []
    for l in range(n_layers):
        in_dim = emb_dim if l == 0 else hid_dim
        w_ih = init(ks[1 + 3 * l], (4 * hid_dim, in_dim))
        w_hh = init(ks[2 + 3 * l], (4 * hid_dim, hid_dim))
        b = init(ks[3 + 3 * l], (1, 4 * hid_dim))            # b_ih + b_hh folded together
        lstm_params.append((w_ih, w_hh, b))
    wq = init(ks[7], (hid_dim, hid_dim))                     # attn.linear_in  (no bias)
    wo_attn = init(ks[8], (hid_dim, 2 * hid_dim))            # attn.linear_out (no bias)
    w_out = init(ks[9], (output_dim, 2 * hid_dim))
    b_out = init(ks[10], (1, output_dim))

    # Inputs.
    tokens = jax.random.randint(ks[11], (batch,), 0, output_dim)          # decoder input tokens
    h0 = init(ks[12], (n_layers, batch, hid_dim), scale=0.5)
    c0 = init(ks[13], (n_layers, batch, hid_dim), scale=0.5)
    encoder_output = init(ks[14], (src_len, batch, hid_dim), scale=0.5)   # torch layout (S, B, H)

    # Glue: embedding gather (dropout == identity in eval) and transpose to batch-major.
    embedded = emb_table[tokens]                                          # (B, E)
    enc_bmh = jnp.transpose(encoder_output, (1, 0, 2))                    # (B, S, H)

    pred, h_out, c_out = decoder_forward(
        embedded, h0, c0, enc_bmh, lstm_params, wq, wo_attn, w_out, b_out)
    jax.block_until_ready((pred, h_out, c_out))

    ref_pred, ref_h, ref_c = decoder_reference(
        embedded, h0, c0, enc_bmh, lstm_params, wq, wo_attn, w_out, b_out)

    assert pred.shape == (batch, output_dim)
    assert h_out.shape == (n_layers, batch, hid_dim)
    assert c_out.shape == (n_layers, batch, hid_dim)
    # Tolerances account for bf16 matmul operands (f32 accumulation) and the
    # approximate EUP reciprocal in the softmax denominator vs. the pure-f32 reference.
    assert jnp.allclose(pred, ref_pred, atol=2e-2, rtol=2e-2)
    assert jnp.allclose(h_out, ref_h, atol=1e-2, rtol=1e-2)
    assert jnp.allclose(c_out, ref_c, atol=1e-2, rtol=1e-2)

    print("KERNEL_OK")
</pallas_src>

<mosaic_0001>
module attributes {stable_mosaic.version = 11 : i64} {
  func.func @kernel(%arg0: memref<8x16xf32, #tpu.memory_space<vmem>>, %arg1: memref<2x8x32xf32, #tpu.memory_space<vmem>>, %arg2: memref<2x8x32xf32, #tpu.memory_space<vmem>>, %arg3: memref<8x8x32xbf16, #tpu.memory_space<vmem>>, %arg4: memref<16x128xbf16, #tpu.memory_space<vmem>>, %arg5: memref<32x128xbf16, #tpu.memory_space<vmem>>, %arg6: memref<1x128xf32, #tpu.memory_space<vmem>>, %arg7: memref<32x128xbf16, #tpu.memory_space<vmem>>, %arg8: memref<32x128xbf16, #tpu.memory_space<vmem>>, %arg9: memref<1x128xf32, #tpu.memory_space<vmem>>, %arg10: memref<32x32xbf16, #tpu.memory_space<vmem>>, %arg11: memref<32x32xbf16, #tpu.memory_space<vmem>>, %arg12: memref<32x32xbf16, #tpu.memory_space<vmem>>, %arg13: memref<32x128xbf16, #tpu.memory_space<vmem>>, %arg14: memref<32x128xbf16, #tpu.memory_space<vmem>>, %arg15: memref<1x128xf32, #tpu.memory_space<vmem>>, %arg16: memref<8x128xf32, #tpu.memory_space<vmem>>, %arg17: memref<2x8x32xf32, #tpu.memory_space<vmem>>, %arg18: memref<2x8x32xf32, #tpu.memory_space<vmem>>) attributes {dimension_semantics = [], scalar_prefetch = 0 : i64, scratch_operands = 0 : i64, tpu.core_type = #tpu.core_type<tc>} {
    %c0 = arith.constant 0 : index
    %c0_0 = arith.constant 0 : index
    %0 = vector.load %arg0[%c0, %c0_0] : memref<8x16xf32, #tpu.memory_space<vmem>>, vector<8x16xf32>
    %c0_1 = arith.constant 0 : index
    %c0_2 = arith.constant 0 : index
    %1 = vector.load %arg4[%c0_1, %c0_2] : memref<16x128xbf16, #tpu.memory_space<vmem>>, vector<16x128xbf16>
    %c0_3 = arith.constant 0 : index
    %c0_4 = arith.constant 0 : index
    %2 = vector.load %arg5[%c0_3, %c0_4] : memref<32x128xbf16, #tpu.memory_space<vmem>>, vector<32x128xbf16>
    %c0_5 = arith.constant 0 : index
    %c0_6 = arith.constant 0 : index
    %3 = vector.load %arg6[%c0_5, %c0_6] : memref<1x128xf32, #tpu.memory_space<vmem>>, vector<1x128xf32>
    %c0_7 = arith.constant 0 : index
    %c0_8 = arith.constant 0 : index
    %c0_9 = arith.constant 0 : index
    %4 = vector.load %arg1[%c0_7, %c0_8, %c0_9] : memref<2x8x32xf32, #tpu.memory_space<vmem>>, vector<1x8x32xf32>
    %5 = vector.shape_cast %4 : vector<1x8x32xf32> to vector<8x32xf32>
    %c0_10 = arith.constant 0 : index
    %c0_11 = arith.constant 0 : index
    %c0_12 = arith.constant 0 : index
    %6 = vector.load %arg2[%c0_10, %c0_11, %c0_12] : memref<2x8x32xf32, #tpu.memory_space<vmem>>, vector<1x8x32xf32>
    %7 = vector.shape_cast %6 : vector<1x8x32xf32> to vector<8x32xf32>
    %8 = arith.truncf %0 : vector<8x16xf32> to vector<8x16xbf16>
    %cst = arith.constant dense<0.000000e+00> : vector<8x128xf32>
    %9 = tpu.matmul %8, %1, %cst {dimension_numbers = #tpu.dot_dimension_numbers<[1], [0], [0], [1], [0, 0, 1, 1], [], []>} : vector<8x16xbf16>, vector<16x128xbf16>, vector<8x128xf32> -> vector<8x128xf32>
    %10 = arith.truncf %5 : vector<8x32xf32> to vector<8x32xbf16>
    %cst_13 = arith.constant dense<0.000000e+00> : vector<8x128xf32>
    %11 = tpu.matmul %10, %2, %cst_13 {dimension_numbers = #tpu.dot_dimension_numbers<[1], [0], [0], [1], [0, 0, 1, 1], [], []>} : vector<8x32xbf16>, vector<32x128xbf16>, vector<8x128xf32> -> vector<8x128xf32>
    %12 = arith.addf %9, %11 : vector<8x128xf32>
    %13 = vector.broadcast %3 : vector<1x128xf32> to vector<8x128xf32>
    %14 = arith.addf %12, %13 : vector<8x128xf32>
    %15 = arith.negf %14 : vector<8x128xf32>
    %16 = math.exp %15 : vector<8x128xf32>
    %cst_14 = arith.constant 1.000000e+00 : f32
    %17 = vector.broadcast %cst_14 : f32 to vector<8x128xf32>
    %18 = arith.addf %17, %16 : vector<8x128xf32>
    %19 = arith.divf %17, %18 : vector<8x128xf32>
    %20 = vector.extract_strided_slice %19 {offsets = [0, 0], sizes = [8, 32], strides = [1, 1]} : vector<8x128xf32> to vector<8x32xf32>
    %21 = vector.extract_strided_slice %19 {offsets = [0, 32], sizes = [8, 32], strides = [1, 1]} : vector<8x128xf32> to vector<8x32xf32>
    %22 = vector.extract_strided_slice %14 {offsets = [0, 64], sizes = [8, 32], strides = [1, 1]} : vector<8x128xf32> to vector<8x32xf32>
    %23 = math.tanh %22 : vector<8x32xf32>
    %24 = vector.extract_strided_slice %19 {offsets = [0, 96], sizes = [8, 32], strides = [1, 1]} : vector<8x128xf32> to vector<8x32xf32>
    %25 = arith.mulf %21, %7 : vector<8x32xf32>
    %26 = arith.mulf %20, %23 : vector<8x32xf32>
    %27 = arith.addf %25, %26 : vector<8x32xf32>
    %28 = math.tanh %27 : vector<8x32xf32>
    %29 = arith.mulf %24, %28 : vector<8x32xf32>
    %c0_15 = arith.constant 0 : index
    %c0_16 = arith.constant 0 : index
    %c0_17 = arith.constant 0 : index
    %30 = vector.load %arg17[%c0_15, %c0_16, %c0_17] : memref<2x8x32xf32, #tpu.memory_space<vmem>>, vector<1x8x32xf32>
    %31 = vector.shape_cast %30 : vector<1x8x32xf32> to vector<8x32xf32>
    %32 = vector.shape_cast %29 : vector<8x32xf32> to vector<1x8x32xf32>
    tpu.vector_store %arg17[%c0_15, %c0_16, %c0_17], %32 {strides = array<i32>} : memref<2x8x32xf32, #tpu.memory_space<vmem>>, vector<1x8x32xf32>,
    %c0_18 = arith.constant 0 : index
    %c0_19 = arith.constant 0 : index
    %c0_20 = arith.constant 0 : index
    %33 = vector.load %arg18[%c0_18, %c0_19, %c0_20] : memref<2x8x32xf32, #tpu.memory_space<vmem>>, vector<1x8x32xf32>
    %34 = vector.shape_cast %33 : vector<1x8x32xf32> to vector<8x32xf32>
    %35 = vector.shape_cast %27 : vector<8x32xf32> to vector<1x8x32xf32>
    tpu.vector_store %arg18[%c0_18, %c0_19, %c0_20], %35 {strides = array<i32>} : memref<2x8x32xf32, #tpu.memory_space<vmem>>, vector<1x8x32xf32>,
    %c0_21 = arith.constant 0 : index
    %c0_22 = arith.constant 0 : index
    %36 = vector.load %arg7[%c0_21, %c0_22] : memref<32x128xbf16, #tpu.memory_space<vmem>>, vector<32x128xbf16>
    %c0_23 = arith.constant 0 : index
    %c0_24 = arith.constant 0 : index
    %37 = vector.load %arg8[%c0_23, %c0_24] : memref<32x128xbf16, #tpu.memory_space<vmem>>, vector<32x128xbf16>
    %c0_25 = arith.constant 0 : index
    %c0_26 = arith.constant 0 : index
    %38 = vector.load %arg9[%c0_25, %c0_26] : memref<1x128xf32, #tpu.memory_space<vmem>>, vector<1x128xf32>
    %c1 = arith.constant 1 : index
    %c0_27 = arith.constant 0 : index
    %c0_28 = arith.constant 0 : index
    %39 = vector.load %arg1[%c1, %c0_27, %c0_28] : memref<2x8x32xf32, #tpu.memory_space<vmem>>, vector<1x8x32xf32>
    %40 = vector.shape_cast %39 : vector<1x8x32xf32> to vector<8x32xf32>
    %c1_29 = arith.constant 1 : index
    %c0_30 = arith.constant 0 : index
    %c0_31 = arith.constant 0 : index
    %41 = vector.load %arg2[%c1_29, %c0_30, %c0_31] : memref<2x8x32xf32, #tpu.memory_space<vmem>>, vector<1x8x32xf32>
    %42 = vector.shape_cast %41 : vector<1x8x32xf32> to vector<8x32xf32>
    %43 = arith.truncf %29 : vector<8x32xf32> to vector<8x32xbf16>
    %cst_32 = arith.constant dense<0.000000e+00> : vector<8x128xf32>
    %44 = tpu.matmul %43, %36, %cst_32 {dimension_numbers = #tpu.dot_dimension_numbers<[1], [0], [0], [1], [0, 0, 1, 1], [], []>} : vector<8x32xbf16>, vector<32x128xbf16>, vector<8x128xf32> -> vector<8x128xf32>
    %45 = arith.truncf %40 : vector<8x32xf32> to vector<8x32xbf16>
    %cst_33 = arith.constant dense<0.000000e+00> : vector<8x128xf32>
    %46 = tpu.matmul %45, %37, %cst_33 {dimension_numbers = #tpu.dot_dimension_numbers<[1], [0], [0], [1], [0, 0, 1, 1], [], []>} : vector<8x32xbf16>, vector<32x128xbf16>, vector<8x128xf32> -> vector<8x128xf32>
    %47 = arith.addf %44, %46 : vector<8x128xf32>
    %48 = vector.broadcast %38 : vector<1x128xf32> to vector<8x128xf32>
    %49 = arith.addf %47, %48 : vector<8x128xf32>
    %50 = arith.negf %49 : vector<8x128xf32>
    %51 = math.exp %50 : vector<8x128xf32>
    %cst_34 = arith.constant 1.000000e+00 : f32
    %52 = vector.broadcast %cst_34 : f32 to vector<8x128xf32>
    %53 = arith.addf %52, %51 : vector<8x128xf32>
    %54 = arith.divf %52, %53 : vector<8x128xf32>
    %55 = vector.extract_strided_slice %54 {offsets = [0, 0], sizes = [8, 32], strides = [1, 1]} : vector<8x128xf32> to vector<8x32xf32>
    %56 = vector.extract_strided_slice %54 {offsets = [0, 32], sizes = [8, 32], strides = [1, 1]} : vector<8x128xf32> to vector<8x32xf32>
    %57 = vector.extract_strided_slice %49 {offsets = [0, 64], sizes = [8, 32], strides = [1, 1]} : vector<8x128xf32> to vector<8x32xf32>
    %58 = math.tanh %57 : vector<8x32xf32>
    %59 = vector.extract_strided_slice %54 {offsets = [0, 96], sizes = [8, 32], strides = [1, 1]} : vector<8x128xf32> to vector<8x32xf32>
    %60 = arith.mulf %56, %42 : vector<8x32xf32>
    %61 = arith.mulf %55, %58 : vector<8x32xf32>
    %62 = arith.addf %60, %61 : vector<8x32xf32>
    %63 = math.tanh %62 : vector<8x32xf32>
    %64 = arith.mulf %59, %63 : vector<8x32xf32>
    %c1_35 = arith.constant 1 : index
    %c0_36 = arith.constant 0 : index
    %c0_37 = arith.constant 0 : index
    %65 = vector.load %arg17[%c1_35, %c0_36, %c0_37] : memref<2x8x32xf32, #tpu.memory_space<vmem>>, vector<1x8x32xf32>
    %66 = vector.shape_cast %65 : vector<1x8x32xf32> to vector<8x32xf32>
    %67 = vector.shape_cast %64 : vector<8x32xf32> to vector<1x8x32xf32>
    tpu.vector_store %arg17[%c1_35, %c0_36, %c0_37], %67 {strides = array<i32>} : memref<2x8x32xf32, #tpu.memory_space<vmem>>, vector<1x8x32xf32>,
    %c1_38 = arith.constant 1 : index
    %c0_39 = arith.constant 0 : index
    %c0_40 = arith.constant 0 : index
    %68 = vector.load %arg18[%c1_38, %c0_39, %c0_40] : memref<2x8x32xf32, #tpu.memory_space<vmem>>, vector<1x8x32xf32>
    %69 = vector.shape_cast %68 : vector<1x8x32xf32> to vector<8x32xf32>
    %70 = vector.shape_cast %62 : vector<8x32xf32> to vector<1x8x32xf32>
    tpu.vector_store %arg18[%c1_38, %c0_39, %c0_40], %70 {strides = array<i32>} : memref<2x8x32xf32, #tpu.memory_space<vmem>>, vector<1x8x32xf32>,
    %c0_41 = arith.constant 0 : index
    %c0_42 = arith.constant 0 : index
    %c0_43 = arith.constant 0 : index
    %71 = vector.load %arg3[%c0_41, %c0_42, %c0_43] : memref<8x8x32xbf16, #tpu.memory_space<vmem>>, vector<8x8x32xbf16>
    %72 = arith.extf %71 : vector<8x8x32xbf16> to vector<8x8x32xf32>
    %73 = arith.truncf %64 : vector<8x32xf32> to vector<8x32xbf16>
    %c0_44 = arith.constant 0 : index
    %c0_45 = arith.constant 0 : index
    %74 = vector.load %arg10[%c0_44, %c0_45] : memref<32x32xbf16, #tpu.memory_space<vmem>>, vector<32x32xbf16>
    %cst_46 = arith.constant dense<0.000000e+00> : vector<8x32xf32>
    %75 = tpu.matmul %73, %74, %cst_46 {dimension_numbers = #tpu.dot_dimension_numbers<[1], [0], [0], [1], [0, 0, 1, 1], [], []>} : vector<8x32xbf16>, vector<32x32xbf16>, vector<8x32xf32> -> vector<8x32xf32>
    %76 = vector.shape_cast %75 : vector<8x32xf32> to vector<8x1x32xf32>
    %77 = vector.broadcast %76 : vector<8x1x32xf32> to vector<8x8x32xf32>
    %78 = arith.mulf %77, %72 : vector<8x8x32xf32>
    %cst_47 = arith.constant dense<0.000000e+00> : vector<8x8xf32>
    %79 = vector.multi_reduction <add>, %78, %cst_47 [2] : vector<8x8x32xf32> to vector<8x8xf32>
    %cst_48 = arith.constant dense<0xFF800000> : vector<8xf32>
    %80 = vector.multi_reduction <maximumf>, %79, %cst_48 [1] : vector<8x8xf32> to vector<8xf32>
    %81 = vector.shape_cast %80 : vector<8xf32> to vector<8x1xf32>
    %82 = vector.broadcast %81 : vector<8x1xf32> to vector<8x8xf32>
    %83 = arith.subf %79, %82 : vector<8x8xf32>
    %84 = math.exp %83 : vector<8x8xf32>
    %cst_49 = arith.constant dense<0.000000e+00> : vector<8xf32>
    %85 = vector.multi_reduction <add>, %84, %cst_49 [1] : vector<8x8xf32> to vector<8xf32>
    %86 = vector.shape_cast %85 : vector<8xf32> to vector<8x1xf32>
    %87 = tpu.reciprocal %86 {approx = true} : vector<8x1xf32> -> vector<8x1xf32>
    %88 = vector.broadcast %87 : vector<8x1xf32> to vector<8x8xf32>
    %89 = arith.mulf %84, %88 : vector<8x8xf32>
    %90 = vector.shape_cast %89 : vector<8x8xf32> to vector<8x8x1xf32>
    %91 = vector.broadcast %90 : vector<8x8x1xf32> to vector<8x8x32xf32>
    %92 = arith.mulf %91, %72 : vector<8x8x32xf32>
    %cst_50 = arith.constant dense<0.000000e+00> : vector<8x32xf32>
    %93 = vector.multi_reduction <add>, %92, %cst_50 [1] : vector<8x8x32xf32> to vector<8x32xf32>
    %94 = arith.truncf %93 : vector<8x32xf32> to vector<8x32xbf16>
    %c0_51 = arith.constant 0 : index
    %c0_52 = arith.constant 0 : index
    %95 = vector.load %arg11[%c0_51, %c0_52] : memref<32x32xbf16, #tpu.memory_space<vmem>>, vector<32x32xbf16>
    %cst_53 = arith.constant dense<0.000000e+00> : vector<8x32xf32>
    %96 = tpu.matmul %94, %95, %cst_53 {dimension_numbers = #tpu.dot_dimension_numbers<[1], [0], [0], [1], [0, 0, 1, 1], [], []>} : vector<8x32xbf16>, vector<32x32xbf16>, vector<8x32xf32> -> vector<8x32xf32>
    %97 = arith.truncf %75 : vector<8x32xf32> to vector<8x32xbf16>
    %c0_54 = arith.constant 0 : index
    %c0_55 = arith.constant 0 : index
    %98 = vector.load %arg12[%c0_54, %c0_55] : memref<32x32xbf16, #tpu.memory_space<vmem>>, vector<32x32xbf16>
    %cst_56 = arith.constant dense<0.000000e+00> : vector<8x32xf32>
    %99 = tpu.matmul %97, %98, %cst_56 {dimension_numbers = #tpu.dot_dimension_numbers<[1], [0], [0], [1], [0, 0, 1, 1], [], []>} : vector<8x32xbf16>, vector<32x32xbf16>, vector<8x32xf32> -> vector<8x32xf32>
    %100 = arith.addf %96, %99 : vector<8x32xf32>
    %101 = math.tanh %100 : vector<8x32xf32>
    %102 = arith.truncf %101 : vector<8x32xf32> to vector<8x32xbf16>
    %c0_57 = arith.constant 0 : index
    %c0_58 = arith.constant 0 : index
    %103 = vector.load %arg13[%c0_57, %c0_58] : memref<32x128xbf16, #tpu.memory_space<vmem>>, vector<32x128xbf16>
    %cst_59 = arith.constant dense<0.000000e+00> : vector<8x128xf32>
    %104 = tpu.matmul %102, %103, %cst_59 {dimension_numbers = #tpu.dot_dimension_numbers<[1], [0], [0], [1], [0, 0, 1, 1], [], []>} : vector<8x32xbf16>, vector<32x128xbf16>, vector<8x128xf32> -> vector<8x128xf32>
    %105 = arith.truncf %64 : vector<8x32xf32> to vector<8x32xbf16>
    %c0_60 = arith.constant 0 : index
    %c0_61 = arith.constant 0 : index
    %106 = vector.load %arg14[%c0_60, %c0_61] : memref<32x128xbf16, #tpu.memory_space<vmem>>, vector<32x128xbf16>
    %cst_62 = arith.constant dense<0.000000e+00> : vector<8x128xf32>
    %107 = tpu.matmul %105, %106, %cst_62 {dimension_numbers = #tpu.dot_dimension_numbers<[1], [0], [0], [1], [0, 0, 1, 1], [], []>} : vector<8x32xbf16>, vector<32x128xbf16>, vector<8x128xf32> -> vector<8x128xf32>
    %108 = arith.addf %104, %107 : vector<8x128xf32>
    %c0_63 = arith.constant 0 : index
    %c0_64 = arith.constant 0 : index
    %109 = vector.load %arg15[%c0_63, %c0_64] : memref<1x128xf32, #tpu.memory_space<vmem>>, vector<1x128xf32>
    %110 = vector.broadcast %109 : vector<1x128xf32> to vector<8x128xf32>
    %111 = arith.addf %108, %110 : vector<8x128xf32>
    %c0_65 = arith.constant 0 : index
    %c0_66 = arith.constant 0 : index
    %112 = vector.load %arg16[%c0_65, %c0_66] : memref<8x128xf32, #tpu.memory_space<vmem>>, vector<8x128xf32>
    tpu.vector_store %arg16[%c0_65, %c0_66], %111 {strides = array<i32>} : memref<8x128xf32, #tpu.memory_space<vmem>>, vector<8x128xf32>,
    return
  }
}

</mosaic_0001>

<bundles_post_ra>
// kernel: tpu_custom_call.1
= control target key start
LH: loop header
LB: loop body
LE: loop exit
PB: predicated region body
PF: predicated region fallthrough
CT: control target
= control target key end

     0   :  { %s2576_s0 = inlined_call_operand.hbm [shape: f32[8,16], index: 0, kind: input, shape index: {}]   ;;  %s2577_s1 = inlined_call_operand.hbm [shape: f32[2,8,32], index: 1, kind: input, shape index: {}]   ;;  %s2578_s2 = inlined_call_operand.hbm [shape: f32[2,8,32], index: 2, kind: input, shape index: {}]   ;;  %s2579_s3 = inlined_call_operand.hbm [shape: bf16[8,8,32], index: 3, kind: input, shape index: {}]   ;;  %s2580_s4 = inlined_call_operand.hbm [shape: bf16[16,128], index: 4, kind: input, shape index: {}]   ;;  %s2581_s5 = inlined_call_operand.vmem [shape: bf16[32,128], index: 5, kind: input, shape index: {}]   ;;  %s2582_s6 = inlined_call_operand.vmem [shape: f32[1,128], index: 6, kind: input, shape index: {}]   ;;  %s2583_s7 = inlined_call_operand.hbm [shape: bf16[32,128], index: 7, kind: input, shape index: {}]   ;;  %s2584_s8 = inlined_call_operand.hbm [shape: bf16[32,128], index: 8, kind: input, shape index: {}]   ;;  %s2585_s9 = inlined_call_operand.hbm [shape: f32[1,128], index: 9, kind: input, shape index: {}]   ;;  %s2586_s10 = inlined_call_operand.vmem [shape: bf16[32,32], index: 10, kind: input, shape index: {}]   ;;  %s2587_s11 = inlined_call_operand.hbm [shape: bf16[32,32], index: 11, kind: input, shape index: {}]   ;;  %s2588_s12 = inlined_call_operand.hbm [shape: bf16[32,32], index: 12, kind: input, shape index: {}]   ;;  %s2589_s13 = inlined_call_operand.vmem [shape: bf16[32,128], index: 13, kind: input, shape index: {}]   ;;  %s2590_s14 = inlined_call_operand.hbm [shape: bf16[32,128], index: 14, kind: input, shape index: {}]   ;;  %s2591_s15 = inlined_call_operand.vmem [shape: f32[1,128], index: 15, kind: input, shape index: {}]   ;;  %s2592_s16 = inlined_call_operand.hbm [shape: f32[8,128], index: 16, kind: output, shape index: {0}]   ;;  %s2593_s17 = inlined_call_operand.hbm [shape: f32[2,8,32], index: 17, kind: output, shape index: {1}]   ;;  %s2594_s18 = inlined_call_operand.hbm [shape: f32[2,8,32], index: 18, kind: output, shape index: {2}]  }
   0x1   :  { %2603 = sst [smem:[#allocation32_spill]] %s2576_s0 }
   0x2   :  { %2604 = sst [smem:[#allocation33_spill]] %s2577_s1 }
   0x3   :  { %2605 = sst [smem:[#allocation34_spill]] %s2578_s2 }
   0x4   :  { %2606 = sst [smem:[#allocation35_spill]] %s2592_s16 }
   0x5   :  { %24 = vsyncpa [#allocation3], 0 }
   0x6   :  { %25 = vsyncpa [#allocation6], 0 }
   0x7   :  { %26 = vsyncpa [#allocation9], 0 }
   0x8   :  { %27 = vsyncpa [#allocation12], 0 }
   0x9   :  { %28 = vsyncpa [#allocation15], 0 }
   0xa   :  { %29 = vsyncpa [#allocation18], 0 }
   0xb   :  { %30 = vsyncpa [#allocation4], 0 }
   0xc   :  { %31 = vsyncpa [#allocation22], 0  ;;  %s1979_s27 = smov [#allocation5]   ;;  %s2607_s0 = sld [smem:[#allocation33_spill]] }
   0xd   :  { %s47_s28 = sshll.u32 %s1979_s27, 4  ;;  %s48_s28 = int_to_ptr.vmem [resolvable:$true] %s47_s28 }
  0x12   :  { %s1655_s19 = scalar_lea.hbm %s2607_s0, 256 }
  0x13   :  { %p1656_p0 = scmp.ne.s32.totalorder %s2607_s0, %s1655_s19  ;;  %p1659_p1 = scmp.lt.u32.totalorder %s1655_s19, %s2607_s0 }
  0x15   :  { %p1661_p2 = pnand %p1659_p1, %p1656_p0 }
  0x17   :  { %1664 = shalt.err (!%p1661_p2)
}
  0x18   :  { %s1665_s2 = scalar_lea.vmem %s48_s28, 256  ;;  %p1670_p4 = scmp.lt.s32.totalorder %s48_s28, %s48_s28 }
  0x19   :  { %p1666_p3 = scmp.ne.s32.totalorder %s48_s28, %s1665_s2  ;;  %p1671_p5 = scmp.lt.s32.totalorder %s1665_s2, %s1665_s2 }
  0x1b   :  { %p1672_p6 = por %p1671_p5, %p1670_p4 }
  0x1d   :  { %p1673_p7 = pnand %p1672_p6, %p1666_p3 }
  0x1f   :  { %1676 = shalt.err (!%p1673_p7)
}
  0x20   :  { %s2599_s23 = smov 128   ;;  %s2601_s24 = smov 8  }
  0x21   :  { %53 = dma.hbm_to_vmem [thread:$0]  %s2607_s0, 256, %s48_s28, [#allocation6], %s2599_s23, %s2599_s23, %s2601_s24  }
  0x22   :  { %s1982_s27 = smov [#allocation8]   ;;  %s1677_s1 = scalar_lea.hbm %s2579_s3, 512 }
  0x23   :  { %s71_s29 = sshll.u32 %s1982_s27, 4  ;;  %p1678_p8 = scmp.ne.s32.totalorder %s2579_s3, %s1677_s1  ;;  %s72_s29 = int_to_ptr.vmem [resolvable:$true] %s71_s29 }
  0x24   :  { %p1681_p9 = scmp.lt.u32.totalorder %s1677_s1, %s2579_s3 }
  0x26   :  { %p1683_p10 = pnand %p1681_p9, %p1678_p8 }
  0x28   :  { %1686 = shalt.err (!%p1683_p10)
}
  0x29   :  { %s1687_s16 = scalar_lea.vmem %s72_s29, 512  ;;  %p1692_p12 = scmp.lt.s32.totalorder %s72_s29, %s72_s29 }
  0x2a   :  { %p1688_p11 = scmp.ne.s32.totalorder %s72_s29, %s1687_s16  ;;  %p1693_p13 = scmp.lt.s32.totalorder %s1687_s16, %s1687_s16 }
  0x2c   :  { %p1694_p0 = por %p1693_p13, %p1692_p12 }
  0x2e   :  { %p1695_p1 = pnand %p1694_p0, %p1688_p11 }
  0x30   :  { %1698 = shalt.err (!%p1695_p1)
}
  0x31   :  { %s1983_s28 = smov 64   ;;  %s1984_s0 = smov 4  }
  0x32   :  { %77 = dma.hbm_to_vmem [thread:$0]  %s2579_s3, 512, %s72_s29, [#allocation9], %s1983_s28, %s1983_s28, %s1984_s0  }
  0x33   :  { %s1985_s27 = smov [#allocation11]   ;;  %s1986_s19 = smov [#allocation14]  }
  0x34   :  { %s99_s30 = sshll.u32 %s1985_s27, 4  ;;  %s124_s1 = sshll.u32 %s1986_s19, 4  ;;  %s100_s30 = int_to_ptr.vmem [resolvable:$true] %s99_s30  ;;  %s125_s1 = int_to_ptr.vmem [resolvable:$true] %s124_s1 }
  0x35   :  { %s1699_s21 = scalar_lea.hbm %s2583_s7, 256 }
  0x36   :  { %p1700_p2 = scmp.ne.s32.totalorder %s2583_s7, %s1699_s21  ;;  %p1703_p3 = scmp.lt.u32.totalorder %s1699_s21, %s2583_s7 }
  0x38   :  { %p1705_p4 = pnand %p1703_p3, %p1700_p2 }
  0x3a   :  { %1708 = shalt.err (!%p1705_p4)
}
  0x3b   :  { %s1709_s3 = scalar_lea.vmem %s100_s30, 256  ;;  %p1714_p6 = scmp.lt.s32.totalorder %s100_s30, %s100_s30 }
  0x3c   :  { %p1710_p5 = scmp.ne.s32.totalorder %s100_s30, %s1709_s3  ;;  %p1715_p7 = scmp.lt.s32.totalorder %s1709_s3, %s1709_s3 }
  0x3e   :  { %p1716_p8 = por %p1715_p7, %p1714_p6 }
  0x40   :  { %p1717_p9 = pnand %p1716_p8, %p1710_p5 }
  0x42   :  { %1720 = shalt.err (!%p1717_p9)
}
  0x43   :  { %105 = dma.hbm_to_vmem [thread:$0]  %s2583_s7, 256, %s100_s30, [#allocation12], %s1983_s28, %s1983_s28, %s1984_s0  }
  0x44   :  { %s1721_s23 = scalar_lea.hbm %s2585_s9, 16 }
  0x45   :  { %p1722_p10 = scmp.ne.s32.totalorder %s2585_s9, %s1721_s23  ;;  %p1725_p11 = scmp.lt.u32.totalorder %s1721_s23, %s2585_s9 }
  0x47   :  { %p1727_p12 = pnand %p1725_p11, %p1722_p10 }
  0x49   :  { %1730 = shalt.err (!%p1727_p12)
}
  0x4a   :  { %s1731_s21 = scalar_lea.vmem %s125_s1, 16  ;;  %s1735_s22 = scalar_lea.vmem %s125_s1, 32 }
  0x4b   :  { %p1732_p13 = scmp.ne.s32.totalorder %s125_s1, %s1731_s21  ;;  %p1736_p0 = scmp.lt.s32.totalorder %s125_s1, %s125_s1 }
  0x4c   :  { %p1737_p1 = scmp.lt.s32.totalorder %s1735_s22, %s1731_s21 }
  0x4e   :  { %p1738_p2 = por %p1737_p1, %p1736_p0 }
  0x50   :  { %p1739_p3 = pnand %p1738_p2, %p1732_p13 }
  0x52   :  { %1742 = shalt.err (!%p1739_p3)
}
  0x53   :  { %127 = dma.hbm_to_vmem [thread:$0]  %s2585_s9, 16, %s125_s1, [#allocation15]  }
  0x54   :  { %s1987_s2 = smov [#allocation17]   ;;  %s1988_s29 = smov [#allocation2]  }
  0x55   :  { %s147_s3 = sshll.u32 %s1987_s2, 4  ;;  %s38_s25 = sshll.u32 %s1988_s29, 4  ;;  %s148_s3 = int_to_ptr.vmem [resolvable:$true] %s147_s3  ;;  %s39_s25 = int_to_ptr.vmem [resolvable:$true] %s38_s25 }
  0x56   :  { %s1743_s23 = scalar_lea.hbm %s2588_s12, 256 }
  0x57   :  { %p1744_p4 = scmp.ne.s32.totalorder %s2588_s12, %s1743_s23  ;;  %p1747_p5 = scmp.lt.u32.totalorder %s1743_s23, %s2588_s12 }
  0x59   :  { %p1749_p6 = pnand %p1747_p5, %p1744_p4 }
  0x5b   :  { %1752 = shalt.err (!%p1749_p6)
}
  0x5c   :  { %s1753_s9 = scalar_lea.vmem %s148_s3, 256  ;;  %p1758_p8 = scmp.lt.s32.totalorder %s148_s3, %s148_s3 }
  0x5d   :  { %p1754_p7 = scmp.ne.s32.totalorder %s148_s3, %s1753_s9  ;;  %p1759_p9 = scmp.lt.s32.totalorder %s1753_s9, %s1753_s9 }
  0x5f   :  { %p1760_p10 = por %p1759_p9, %p1758_p8 }
  0x61   :  { %p1761_p11 = pnand %p1760_p10, %p1754_p7 }
  0x63   :  { %1764 = shalt.err (!%p1761_p11)
}
  0x64   :  { %153 = dma.hbm_to_vmem [thread:$0]  %s2588_s12, 256, %s148_s3, [#allocation18], %s1983_s28, %s1983_s28, %s1984_s0  }
  0x65   :  { %s2608_s30 = sld [smem:[#allocation32_spill]] }
  0x6b   :  { %s1765_s2 = scalar_lea.hbm %s2608_s30, 128 }
  0x6c   :  { %p1766_p12 = scmp.ne.s32.totalorder %s2608_s30, %s1765_s2  ;;  %p1769_p13 = scmp.lt.u32.totalorder %s1765_s2, %s2608_s30 }
  0x6e   :  { %p1771_p0 = pnand %p1769_p13, %p1766_p12 }
  0x70   :  { %1774 = shalt.err (!%p1771_p0)
}
  0x71   :  { %s1775_s24 = scalar_lea.vmem %s39_s25, 128  ;;  %p1780_p2 = scmp.lt.s32.totalorder %s39_s25, %s39_s25 }
  0x72   :  { %p1776_p1 = scmp.ne.s32.totalorder %s39_s25, %s1775_s24  ;;  %p1781_p3 = scmp.lt.s32.totalorder %s1775_s24, %s1775_s24 }
  0x74   :  { %p1782_p4 = por %p1781_p3, %p1780_p2 }
  0x76   :  { %p1783_p5 = pnand %p1782_p4, %p1776_p1 }
  0x78   :  { %1786 = shalt.err (!%p1783_p5)
}
  0x79   :  { %41 = dma.hbm_to_vmem [thread:$0]  %s2608_s30, 128, %s39_s25, [#allocation3]  }
  0x7a   :  { %s1989_s19 = smov [#allocation7]   ;;  %s1990_s16 = smov [#allocation10]  }
  0x7b   :  { %s59_s20 = sshll.u32 %s1989_s19, 4  ;;  %s83_s9 = sshll.u32 %s1990_s16, 4  ;;  %s60_s20 = int_to_ptr.vmem [resolvable:$true] %s59_s20  ;;  %s2182_s9 = int_to_ptr.vmem [resolvable:$true] %s83_s9 }
  0x7c   :  { %s2609_s22 = sld [smem:[#allocation34_spill]] }
  0x82   :  { %s1787_s7 = scalar_lea.hbm %s2609_s22, 256 }
  0x83   :  { %p1788_p6 = scmp.ne.s32.totalorder %s2609_s22, %s1787_s7  ;;  %p1791_p7 = scmp.lt.u32.totalorder %s1787_s7, %s2609_s22 }
  0x85   :  { %p1793_p8 = pnand %p1791_p7, %p1788_p6 }
  0x87   :  { %1796 = shalt.err (!%p1793_p8)
}
  0x88   :  { %s1797_s25 = scalar_lea.vmem %s60_s20, 256  ;;  %p1802_p10 = scmp.lt.s32.totalorder %s60_s20, %s60_s20 }
  0x89   :  { %p1798_p9 = scmp.ne.s32.totalorder %s60_s20, %s1797_s25  ;;  %p1803_p11 = scmp.lt.s32.totalorder %s1797_s25, %s1797_s25 }
  0x8b   :  { %p1804_p12 = por %p1803_p11, %p1802_p10 }
  0x8d   :  { %p1805_p13 = pnand %p1804_p12, %p1798_p9 }
  0x8f   :  { %1808 = shalt.err (!%p1805_p13)
}
  0x90   :  { %s2610_s30 = smov 8   ;;  %s2611_s23 = smov 128  }
  0x91   :  { %65 = dma.hbm_to_vmem [thread:$0]  %s2609_s22, 256, %s60_s20, [#allocation6], %s2611_s23, %s2611_s23, %s2610_s30  }
  0x92   :  { %s1809_s16 = scalar_lea.hbm %s2580_s4, 128 }
  0x93   :  { %p1810_p0 = scmp.ne.s32.totalorder %s2580_s4, %s1809_s16  ;;  %p1813_p1 = scmp.lt.u32.totalorder %s1809_s16, %s2580_s4 }
  0x95   :  { %p1815_p2 = pnand %p1813_p1, %p1810_p0 }
  0x97   :  { %1818 = shalt.err (!%p1815_p2)
}
  0x98   :  { %s1819_s29 = scalar_lea.vmem %s2182_s9, 128  ;;  %p1824_p4 = scmp.lt.s32.totalorder %s2182_s9, %s2182_s9 }
  0x99   :  { %p1820_p3 = scmp.ne.s32.totalorder %s2182_s9, %s1819_s29  ;;  %p1825_p5 = scmp.lt.s32.totalorder %s1819_s29, %s1819_s29 }
  0x9b   :  { %p1826_p6 = por %p1825_p5, %p1824_p4 }
  0x9d   :  { %p1827_p7 = pnand %p1826_p6, %p1820_p3 }
  0x9f   :  { %1830 = shalt.err (!%p1827_p7)
}
  0xa0   :  { %89 = dma.hbm_to_vmem [thread:$0]  %s2580_s4, 128, %s2182_s9, [#allocation9], %s1983_s28, %s1983_s28, %s1984_s0  }
  0xa1   :  { %s1991_s26 = smov [#allocation13]   ;;  %s1992_s25 = smov [#allocation16]  }
  0xa2   :  { %s111_s27 = sshll.u32 %s1991_s26, 4  ;;  %s135_s24 = sshll.u32 %s1992_s25, 4  ;;  %s112_s27 = int_to_ptr.vmem [resolvable:$true] %s111_s27  ;;  %s2219_s24 = int_to_ptr.vmem [resolvable:$true] %s135_s24 }
  0xa3   :  { %s1831_s19 = scalar_lea.hbm %s2584_s8, 256 }
  0xa4   :  { %p1832_p8 = scmp.ne.s32.totalorder %s2584_s8, %s1831_s19  ;;  %p1835_p9 = scmp.lt.u32.totalorder %s1831_s19, %s2584_s8 }
  0xa6   :  { %p1837_p10 = pnand %p1835_p9, %p1832_p8 }
  0xa8   :  { %1840 = shalt.err (!%p1837_p10)
}
  0xa9   :  { %s1841_s4 = scalar_lea.vmem %s112_s27, 256  ;;  %p1846_p12 = scmp.lt.s32.totalorder %s112_s27, %s112_s27 }
  0xaa   :  { %p1842_p11 = scmp.ne.s32.totalorder %s112_s27, %s1841_s4  ;;  %p1847_p13 = scmp.lt.s32.totalorder %s1841_s4, %s1841_s4 }
  0xac   :  { %p1848_p0 = por %p1847_p13, %p1846_p12 }
  0xae   :  { %p1849_p1 = pnand %p1848_p0, %p1842_p11 }
  0xb0   :  { %1852 = shalt.err (!%p1849_p1)
}
  0xb1   :  { %117 = dma.hbm_to_vmem [thread:$0]  %s2584_s8, 256, %s112_s27, [#allocation12], %s1983_s28, %s1983_s28, %s1984_s0  }
  0xb2   :  { %s1853_s22 = scalar_lea.hbm %s2587_s11, 256 }
  0xb3   :  { %p1854_p2 = scmp.ne.s32.totalorder %s2587_s11, %s1853_s22  ;;  %p1857_p3 = scmp.lt.u32.totalorder %s1853_s22, %s2587_s11 }
  0xb5   :  { %p1859_p4 = pnand %p1857_p3, %p1854_p2 }
  0xb7   :  { %1862 = shalt.err (!%p1859_p4)
}
  0xb8   :  { %s1863_s19 = scalar_lea.vmem %s2219_s24, 256  ;;  %p1868_p6 = scmp.lt.s32.totalorder %s2219_s24, %s2219_s24 }
  0xb9   :  { %p1864_p5 = scmp.ne.s32.totalorder %s2219_s24, %s1863_s19  ;;  %p1869_p7 = scmp.lt.s32.totalorder %s1863_s19, %s1863_s19 }
  0xbb   :  { %p1870_p8 = por %p1869_p7, %p1868_p6 }
  0xbd   :  { %p1871_p9 = pnand %p1870_p8, %p1864_p5 }
  0xbf   :  { %1874 = shalt.err (!%p1871_p9)
}
  0xc0   :  { %141 = dma.hbm_to_vmem [thread:$0]  %s2587_s11, 256, %s2219_s24, [#allocation15], %s1983_s28, %s1983_s28, %s1984_s0  }
  0xc1   :  { %s1993_s16 = smov [#allocation19]   ;;  %s1875_s4 = scalar_lea.hbm %s2590_s14, 256 }
  0xc2   :  { %s161_s1 = sshll.u32 %s1993_s16, 4  ;;  %p1876_p10 = scmp.ne.s32.totalorder %s2590_s14, %s1875_s4  ;;  %s162_s1 = int_to_ptr.vmem [resolvable:$true] %s161_s1 }
  0xc3   :  { %p1879_p11 = scmp.lt.u32.totalorder %s1875_s4, %s2590_s14 }
  0xc5   :  { %p1881_p12 = pnand %p1879_p11, %p1876_p10 }
  0xc7   :  { %1884 = shalt.err (!%p1881_p12)
}
  0xc8   :  { %s1885_s22 = scalar_lea.vmem %s162_s1, 256  ;;  %p1890_p0 = scmp.lt.s32.totalorder %s162_s1, %s162_s1 }
  0xc9   :  { %p1886_p13 = scmp.ne.s32.totalorder %s162_s1, %s1885_s22  ;;  %p1891_p1 = scmp.lt.s32.totalorder %s1885_s22, %s1885_s22 }
  0xcb   :  { %p1892_p2 = por %p1891_p1, %p1890_p0 }
  0xcd   :  { %p1893_p3 = pnand %p1892_p2, %p1886_p13 }
  0xcf   :  { %1896 = shalt.err (!%p1893_p3)
}
  0xd0   :  { %167 = dma.hbm_to_vmem [thread:$0]  %s2590_s14, 256, %s162_s1, [#allocation18], %s1983_s28, %s1983_s28, %s1984_s0  }
  0xd1   :  { %1963 = dma.done.wait [#allocation3], 128  }
  0xd2   :  { %1964 = vsyncadd [#allocation3], 4294967168 }
  0xd3   :  { %1965 = dma.done.wait [#allocation6], 512  }
  0xd4   :  { %1966 = vsyncadd [#allocation6], 4294966784 }
  0xd5   :  { %1967 = dma.done.wait [#allocation9], 640  }
  0xd6   :  { %1968 = vsyncadd [#allocation9], 4294966656 }
  0xd7   :  { %1969 = dma.done.wait [#allocation12], 512  }
  0xd8   :  { %1970 = vsyncadd [#allocation12], 4294966784 }
  0xd9   :  { %1971 = dma.done.wait [#allocation15], 272  }
  0xda   :  { %1972 = vsyncadd [#allocation15], 4294967024 }
  0xdb   :  { %1973 = dma.done.wait [#allocation18], 512  }
  0xdc   :  { %1974 = vsyncadd [#allocation18], 4294966784  ;;  %v1994_v0 = vmov 0.0   ;;  %vm1995_vm0 = vmmov 0   ;;  %v1602_v1 = vld [vmem:[%s2581_s5] sm:$0xff]   ;;  %v1603_v2 = vld [vmem:[#allocation10] sm:$0xff]  }
  0xdd   :  { %1502 = vmatprep.subr.bf16.mxu0 %v1994_v0  ;;  %1510 = vmatprep.subr.bf16.mxu1 %v1994_v0  ;;  %v1604_v3 = vld [vmem:[%s2581_s5 + $0x8] sm:$0xff]   ;;  %v204_v4 = vld [vmem:[#allocation2] sm:$0xff]  ;;  %vm278_vm1 = vcmask 130048   ;;  %v212_v5 = vld [vmem:[#allocation5] sm:$0xff]  ;;  %vm228_vm2 = vcmask 261120   ;;  %s1996_s3 = smov 32  }
  0xde   :  { %1512 = vmatprep.mubr.msk.bf16.mxu1 %vm1995_vm0, %v1994_v0  ;;  %1506 = vmatprep.mubr.msk.bf16.mxu0 %vm1995_vm0, %v1994_v0  ;;  %v214_v6 = vpack.c.bf16 %v204_v4, %v204_v4  ;;  %v215_v7 = vpack.c.bf16 %v212_v5, %v212_v5  ;;  %v1431_v11 = vld [vmem:[%s2582_s6] ss:$0 sm:$0xff]  ;;  %v213_v20 = vld [vmem:[#allocation7] sm:$0xff]  ;;  %v1605_v31 = vld [vmem:[#allocation13] sm:$0xff]   ;;  %vm785_vm3 = vcmask 1041409   ;;  %vm787_vm4 = vcmask 1042434  }
  0xdf   :  { %1503 = vmatpush3.bf16.msra.mxu0 %v1602_v1  ;;  %1511 = vmatpush3.bf16.msra.mxu1 %v1603_v2  ;;  %v1606_v32 = vld [vmem:[#allocation11] sm:$0xff]   ;;  %v1607_v33 = vld [vmem:[#allocation13 + $0x8] sm:$0xff]   ;;  %v1608_v34 = vld [vmem:[#allocation11 + $0x8] sm:$0xff]   ;;  %vm789_vm5 = vcmask 1043459   ;;  %vm791_vm6 = vcmask 1044484   ;;  %vm793_vm7 = vcmask 1045509  }
  0xe0   :  { %1504 = vmatprep.subr.bf16.mxu0 %v1994_v0  ;;  %1516 = vmatprep.subr.bf16.mxu1 %v1994_v0  ;;  %v377_v35 = vld [vmem:[#allocation5 + $0x8] sm:$0xff]  ;;  %v379_v41 = vld [vmem:[#allocation7 + $0x8] sm:$0xff]  ;;  %vm795_vm8 = vcmask 1046534   ;;  %vm797_vm9 = vcmask 1047559   ;;  %vm800_vm10 = vcmask 64512   ;;  %s2000_s7 = smov [#allocation21]  }
  0xe1   :  { %v381_v36 = vpack.c.bf16 %v377_v35, %v377_v35  ;;  %v1439_v47 = vld [vmem:[#allocation14] ss:$0 sm:$0xff]  ;;  %s1390_s4 = sshll.u32 %s2000_s7, 4  ;;  %s1391_s4 = int_to_ptr.vmem [resolvable:$true] %s1390_s4 }
  0xe2   :  { %1513 = vmatmul.mubr.msk.bf16.vlgmr.msra.gmra.mrb[0].mxu1 %vm278_vm1, %v214_v6  ;;  %v1609_v2 = vld [vmem:[%s2586_s10] sm:$0xff]   ;;  %v1613_v6 = vld [vmem:[#allocation17] sm:$0xff]   ;;  %s1897_s9 = scalar_lea.vmem %s1391_s4, 256  ;;  %p1902_p5 = scmp.lt.s32.totalorder %s1391_s4, %s1391_s4 }
  0xe3   :  { %1505 = vmatpush3.bf16.msra.mxu0 %v1604_v3  ;;  %1520 = vmatprep.mubr.msk.bf16.mxu1 %vm1995_vm0, %v1994_v0  ;;  %v1610_v3 = vld [vmem:[%s2586_s10 + $0x8] sm:$0xff]   ;;  %s1999_s10 = smov 96   ;;  %p1898_p4 = scmp.ne.s32.totalorder %s1391_s4, %s1897_s9 }
  0xe4   :  { %1524 = vmatprep.subr.bf16.mxu0 %v1994_v0  ;;  %1517 = vmatpush3.bf16.msra.mxu1 %v1605_v31  ;;  %p1903_p6 = scmp.lt.s32.totalorder %s1897_s9, %s1897_s9 }
  0xe5   :  { %1518 = vmatprep.subr.bf16.mxu1 %v1994_v0 }
  0xe6   :  { %1507 = vmatmul.mubr.msk.bf16.vlgmr.msra.gmra.mrb[0].mxu0 %vm228_vm2, %v215_v7  ;;  %p1904_p7 = por %p1903_p6, %p1902_p5 }
  0xe7   :  { %1528 = vmatprep.mubr.msk.bf16.mxu0 %vm1995_vm0, %v1994_v0  ;;  %1525 = vmatpush3.bf16.msra.mxu0 %v1606_v32 }
  0xe8   :  { %1526 = vmatprep.subr.bf16.mxu0 %v1994_v0  ;;  %1519 = vmatpush3.bf16.msra.mxu1 %v1607_v33  ;;  %p1905_p8 = pnand %p1904_p7, %p1898_p4 }
  0xe9   :  { %1532 = vmatprep.subr.bf16.mxu1 %v1994_v0 }
  0xeb   :  { %1527 = vmatpush3.bf16.msra.mxu0 %v1608_v34  ;;  %1521 = vmatmul.mubr.msk.bf16.vlgmr.msra.gmra.mrb[4].mxu1 %vm228_vm2, %v381_v36  ;;  %v2359_v34 = vld [vmem:[#allocation8 + $0x10] sm:$0xff]  }
  0xec   :  { %1540 = vmatprep.subr.bf16.mxu0 %v1994_v0  ;;  %1536 = vmatprep.mubr.msk.bf16.mxu1 %vm1995_vm0, %v1994_v0 }
  0xed   :  { %1533 = vmatpush3.bf16.msra.mxu1 %v1609_v2 }
  0xee   :  { %1534 = vmatprep.subr.bf16.mxu1 %v1994_v0 }
  0xf1   :  { %1535 = vmatpush3.bf16.msra.mxu1 %v1610_v3  ;;  %v1468_v3 = vunpack.c.h.bf16 %v2359_v34 }
  0xf2   :  { %1556 = vmatprep.subr.bf16.mxu1 %v1994_v0 }
 0x1b5   :  { %v316_v8 = vpop.f32.mrb[0].mxu1 }
 0x1b6   :  { %v1514_v9 = vpop.f32.mrb[1].mxu1 }
 0x1b7   :  { %v319_v10 = vpop.f32.mrb[2].mxu1  ;;  %v1611_v9 = vld [vmem:[#allocation19] sm:$0xff]  }
 0x1b8   :  { %v1515_v13 = vpop.f32.mrb[3].mxu1 }
 0x1b9   :  { %v266_v12 = vpop.f32.mrb[0].mxu0  ;;  %v1997_v13 = vmov 1966171168  }
 0x1ba   :  { %v317_v14 = vadd.f32 %v316_v8, %v266_v12  ;;  %v1508_v15 = vpop.f32.mrb[1].mxu0  ;;  %v1614_v12 = vld [vmem:[#allocation17 + $0x8] sm:$0xff]  }
 0x1bb   :  { %v269_v16 = vpop.f32.mrb[2].mxu0  ;;  %v626_v15 = vlaneseq }
 0x1bc   :  { %v328_v17 = vadd.f32 %v1431_v11, %v317_v14  ;;  %v1509_v18 = vpop.f32.mrb[3].mxu0  ;;  %v1612_v11 = vld [vmem:[#allocation19 + $0x8] sm:$0xff]   ;;  %v624_v14 = vunpack.c.l.s4 %v1997_v13 }
 0x1be   :  { %1619 = vtanh.f32 %v328_v17  ;;  %v1432_v21 = vmul.f32 -1.442695, %v328_v17  ;;  %v431_v42 = vpop.f32.mrb[4].mxu1  ;;  %v625_v16 = vunpack.c.0.s8 %v624_v14  ;;  %v2347_v17 = vshrl.u32 %v626_v15, 7 }
 0x1bf   :  { %v1522_v43 = vpop.f32.mrb[5].mxu1 }
 0x1c0   :  { %1621 = vpow2.f32 %v1432_v21  ;;  %v434_v44 = vpop.f32.mrb[6].mxu1  ;;  %v628_v18 = vsub.s32 %v625_v16, %v2347_v17 }
 0x1c1   :  { %v1523_v45 = vpop.f32.mrb[7].mxu1 }
 0x1c8   :  { %v1620_v19 = vpop.eup %1619 }
 0x1c9   :  { %342 = vrot.lane.b32.xlu0 %v1620_v19, %s1983_s28 }
 0x1ca   :  { %v1622_v22 = vpop.eup %1621 }
 0x1cb   :  { %v332_v23 = vadd.f32 1.0, %v1622_v22 }
 0x1cd   :  { %337 = vrot.lane.b32.xlu0 %v213_v20, %s1996_s3  ;;  %1623 = vrcp.f32 %v332_v23  ;;  %v2350_v20 = vld [vmem:[#allocation8] sm:$0xff]  }
 0x1ce   :  { %v1459_v33 = vunpack.c.l.bf16 %v2350_v20  ;;  %v1460_v35 = vunpack.c.h.bf16 %v2350_v20 }
 0x1d7   :  { %v1624_v24 = vpop.eup %1623 }
 0x23b   :  { %v343_v25 = vpop.permute.xlu0 %342 }
 0x23c   :  { %v345_v26 = vmul.f32 %v1624_v24, %v343_v25  ;;  %v2353_v25 = vsub.s32 0, %v2347_v17 }
 0x23e   :  { %347 = vrot.lane.b32.xlu1 %v345_v26, %s1996_s3  ;;  %v2355_v26 = vld [vmem:[#allocation8 + $0x8] sm:$0xff]  }
 0x23f   :  { %v338_v27 = vpop.permute.xlu0 %337  ;;  %v1463_v36 = vunpack.c.l.bf16 %v2355_v26 }
 0x240   :  { %v340_v28 = vmul.f32 %v1624_v24, %v338_v27 }
 0x2b0   :  { %v348_v29 = vpop.permute.xlu1 %347 }
 0x2b1   :  { %v2297_v30 = vadd.f32 %v348_v29, %v340_v28 }
 0x2b3   :  { %1625 = vtanh.f32 %v2297_v30 }
 0x2bd   :  { %v1626_v37 = vpop.eup %1625 }
 0x2be   :  { %353 = vrot.lane.b32.xlu1 %v1626_v37, %s1983_s28 }
 0x330   :  { %v354_v38 = vpop.permute.xlu1 %353 }
 0x331   :  { %v2308_v39 = vmul.f32 %v1624_v24, %v354_v38 }
 0x333   :  { %v380_v40 = vpack.c.bf16 %v2308_v39, %v2308_v39 }
 0x335   :  { %438 = vrot.lane.b32.xlu0 %v380_v40, %s1996_s3 }
 0x339   :  { %510 = vrot.lane.b32.xlu0 %v379_v41, %s1996_s3 }
 0x3a7   :  { %v439_v46 = vpop.permute.xlu0 %438 }
 0x3a8   :  { %1529 = vmatmul.mubr.msk.bf16.vlgmr.msra.gmra.mrb[4].mxu0 %vm228_vm2, %v439_v46 }
 0x3a9   :  { %1544 = vmatprep.mubr.msk.bf16.mxu0 %vm1995_vm0, %v1994_v0  ;;  %1541 = vmatpush3.bf16.msra.mxu0 %v1613_v6 }
 0x3aa   :  { %1542 = vmatprep.subr.bf16.mxu0 %v1994_v0 }
 0x3ab   :  { %v511_v61 = vpop.permute.xlu0 %510 }
 0x3ad   :  { %1543 = vmatpush3.bf16.msra.mxu0 %v1614_v12 }
 0x3ae   :  { %1548 = vmatprep.subr.bf16.mxu0 %v1994_v0 }
 0x47b   :  { %v489_v48 = vpop.f32.mrb[4].mxu0 }
 0x47c   :  { %v490_v49 = vadd.f32 %v489_v48, %v431_v42  ;;  %v1530_v50 = vpop.f32.mrb[5].mxu0  ;;  %v1467_v42 = vunpack.c.l.bf16 %v2359_v34 }
 0x47d   :  { %v492_v51 = vpop.f32.mrb[6].mxu0  ;;  %v1464_v50 = vunpack.c.h.bf16 %v2355_v26 }
 0x47e   :  { %v501_v52 = vadd.f32 %v1439_v47, %v490_v49  ;;  %v1531_v53 = vpop.f32.mrb[7].mxu0  ;;  %v2375_v51 = vld [vmem:[#allocation8 + $0x18] sm:$0xff]  }
 0x47f   :  { %v1472_v13 = vunpack.c.h.bf16 %v2375_v51 }
 0x480   :  { %1627 = vtanh.f32 %v501_v52  ;;  %v1440_v55 = vmul.f32 -1.442695, %v501_v52 }
 0x482   :  { %1629 = vpow2.f32 %v1440_v55 }
 0x48a   :  { %v1628_v54 = vpop.eup %1627 }
 0x48b   :  { %515 = vrot.lane.b32.xlu1 %v1628_v54, %s1983_s28 }
 0x48c   :  { %v1630_v56 = vpop.eup %1629 }
 0x48d   :  { %v505_v57 = vadd.f32 1.0, %v1630_v56 }
 0x48f   :  { %1631 = vrcp.f32 %v505_v57 }
 0x499   :  { %v1632_v58 = vpop.eup %1631 }
 0x49a   :  { %v513_v62 = vmul.f32 %v1632_v58, %v511_v61 }
 0x4fd   :  { %v516_v59 = vpop.permute.xlu1 %515 }
 0x4fe   :  { %v518_v60 = vmul.f32 %v1632_v58, %v516_v59 }
 0x500   :  { %520 = vrot.lane.b32.xlu1 %v518_v60, %s1996_s3 }
 0x572   :  { %v521_v63 = vpop.permute.xlu1 %520 }
 0x573   :  { %v2319_v1 = vadd.f32 %v521_v63, %v513_v62  ;;  %v1471_v63 = vunpack.c.l.bf16 %v2375_v51 }
 0x575   :  { %1633 = vtanh.f32 %v2319_v1 }
 0x57f   :  { %v1634_v4 = vpop.eup %1633 }
 0x580   :  { %526 = vrot.lane.b32.xlu0 %v1634_v4, %s1983_s28 }
 0x5f2   :  { %v527_v5 = vpop.permute.xlu0 %526 }
 0x5f3   :  { %v2331_v7 = vmul.f32 %v1632_v58, %v527_v5 }
 0x5f5   :  { %v558_v8 = vpack.c.bf16 %v2331_v7, %v2331_v7 }
 0x5f7   :  { %564 = vrot.lane.b32.xlu1 %v558_v8, %s1996_s3 }
 0x669   :  { %v565_v10 = vpop.permute.xlu1 %564 }
 0x66a   :  { %1537 = vmatmul.mubr.msk.bf16.vlgmr.msra.gmra.mrb[8].mxu1 %vm228_vm2, %v565_v10 }
 0x66b   :  { %1557 = vmatpush3.bf16.msra.mxu1 %v1611_v9  ;;  %1560 = vmatprep.mubr.msk.bf16.mxu1 %vm1995_vm0, %v1994_v0 }
 0x66c   :  { %1558 = vmatprep.subr.bf16.mxu1 %v1994_v0 }
 0x66f   :  { %1559 = vmatpush3.bf16.msra.mxu1 %v1612_v11 }
 0x670   :  { %1564 = vmatprep.subr.bf16.mxu1 %v1994_v0 }
 0x672   :  { %1561 = vmatmul.mubr.msk.bf16.vlgmr.msra.gmra.mrb[12].mxu1 %vm228_vm2, %v565_v10 }
 0x673   :  { %1568 = vmatprep.mubr.msk.bf16.mxu1 %vm1995_vm0, %v1994_v0 }
 0x73d   :  { %v615_v19 = vpop.f32.mrb[8].mxu1 }
 0x73e   :  { %v622_v21 = vcombine.high %v615_v19, %v615_v19  ;;  %v629_v22 = vrot.slane %v615_v19, %v628_v18  ;;  %v1110_v23 = vpack.c.bf16 %v615_v19, %v615_v19  ;;  %v1538_v24 = vpop.f32.mrb[9].mxu1 }
 0x73f   :  { %v618_v27 = vpop.f32.mrb[10].mxu1 }
 0x740   :  { %v636_v28 = vrot.slane %v622_v21, %v628_v18  ;;  %v637_v29 = vcombine.high %v629_v22, %v629_v22  ;;  %v645_v31 = vrot.slane %v629_v22, %v628_v18  ;;  %v1539_v32 = vpop.f32.mrb[11].mxu1  ;;  %1545 = vmatmul.mubr.msk.bf16.vlgmr.msra.gmra.mrb[8].mxu0 %vm228_vm2, %v1110_v23  ;;  %v752_v22 = vand.u32 127, %v626_v15 }
 0x741   :  { %1552 = vmatprep.mubr.msk.bf16.mxu0 %vm1995_vm0, %v1994_v0 }
 0x742   :  { %v638_v37 = vcombine.high %v636_v28, %v636_v28  ;;  %v674_v38 = vrot.slane %v645_v31, %v2353_v25  ;;  %v659_v40 = vrot.slane %v637_v29, %v628_v18  ;;  %v667_v41 = vcombine.high %v645_v31, %v645_v31 }
 0x743   :  { %v652_v43 = vrot.slane %v636_v28, %v628_v18  ;;  %v2408_v24 = vsub.s32 %v752_v22, %v2347_v17 }
 0x744   :  { %v711_v44 = vmul.f32 %v1459_v33, %v674_v38  ;;  %v678_v45 = vrot.slane %v659_v40, %v2353_v25  ;;  %v682_v46 = vrot.slane %v667_v41, %v2353_v25  ;;  %v669_v47 = vcombine.high %v659_v40, %v659_v40 }
 0x745   :  { %v2371_v48 = vpop.f32.mrb[12].mxu1  ;;  %v690_v49 = vrot.slane %v652_v43, %v2353_v25  ;;  %v668_v52 = vcombine.high %v652_v43, %v652_v43  ;;  %v666_v53 = vrot.slane %v638_v37, %v628_v18 }
 0x746   :  { %v1562_v54 = vpop.f32.mrb[13].mxu1  ;;  %v719_v55 = vsel %vm228_vm2, %v711_v44, 0.0  ;;  %v712_v56 = vmul.f32 %v1460_v35, %v678_v45  ;;  %v713_v57 = vmul.f32 %v1463_v36, %v682_v46  ;;  %v686_v58 = vrot.slane %v669_v47, %v2353_v25 }
 0x747   :  { %720 = vadd.xlane.f32.xlu0 %v719_v55  ;;  %v1308_v59 = vpop.f32.mrb[14].mxu1  ;;  %v715_v62 = vmul.f32 %v1467_v42, %v690_v49  ;;  %v698_v2 = vrot.slane %v668_v52, %v2353_v25  ;;  %v694_v6 = vrot.slane %v666_v53, %v2353_v25  ;;  %v670_v8 = vcombine.high %v666_v53, %v666_v53 }
 0x748   :  { %v1563_v60 = vpop.f32.mrb[15].mxu1  ;;  %v722_v61 = vsel %vm228_vm2, %v712_v56, 0.0  ;;  %v725_v4 = vsel %vm228_vm2, %v713_v57, 0.0  ;;  %v714_v5 = vmul.f32 %v1464_v50, %v686_v58  ;;  %v1998_v59 = vmov 0  }
 0x749   :  { %723 = vadd.xlane.f32.xlu1 %v722_v61  ;;  %v731_v9 = vsel %vm228_vm2, %v715_v62, 0.0  ;;  %v717_v10 = vmul.f32 %v1471_v63, %v698_v2  ;;  %v716_v12 = vmul.f32 %v1468_v3, %v694_v6  ;;  %v702_v14 = vrot.slane %v670_v8, %v2353_v25  ;;  %1600 = vset.pattern.permute.xlu0 %v1998_v59 }
 0x74a   :  { %v728_v11 = vsel %vm228_vm2, %v714_v5, 0.0  ;;  %1601 = vset.pattern.permute.xlu1 %v1998_v59  ;;  %v811_v60 = vsub.s32 1, %v2347_v17  ;;  %v815_v61 = vsub.s32 2, %v2347_v17  ;;  %v819_v62 = vsub.s32 3, %v2347_v17 }
 0x74b   :  { %726 = vadd.xlane.f32.xlu0 %v725_v4  ;;  %v737_v16 = vsel %vm228_vm2, %v717_v10, 0.0  ;;  %v734_v18 = vsel %vm228_vm2, %v716_v12, 0.0  ;;  %v718_v19 = vmul.f32 %v1472_v13, %v702_v14  ;;  %v823_v10 = vsub.s32 4, %v2347_v17 }
 0x74d   :  { %732 = vadd.xlane.f32.xlu1 %v731_v9  ;;  %v740_v21 = vsel %vm228_vm2, %v718_v19, 0.0 }
 0x74f   :  { %729 = vadd.xlane.f32.xlu0 %v728_v11 }
 0x751   :  { %738 = vadd.xlane.f32.xlu1 %v737_v16 }
 0x753   :  { %735 = vadd.xlane.f32.xlu0 %v734_v18  ;;  %v827_v18 = vsub.s32 5, %v2347_v17 }
 0x757   :  { %741 = vadd.xlane.f32.xlu0 %v740_v21 }
 0x7d4   :  { %v721_v23 = vpop.xlane.xlu0 %720 }
 0x7d5   :  { %v756_v31 = vrot.slane %v721_v23, %v2408_v24 }
 0x7d6   :  { %v724_v27 = vpop.xlane.xlu1 %723 }
 0x7d7   :  { %v760_v28 = vrot.slane %v724_v27, %v2408_v24 }
 0x7d8   :  { %v727_v29 = vpop.xlane.xlu0 %726 }
 0x7d9   :  { %v764_v32 = vrot.slane %v727_v29, %v2408_v24  ;;  %v786_v37 = vsel %vm785_vm3, %v760_v28, %v756_v31 }
 0x7da   :  { %v733_v38 = vpop.xlane.xlu1 %732 }
 0x7db   :  { %v788_v41 = vsel %vm787_vm4, %v764_v32, %v786_v37  ;;  %v772_v44 = vrot.slane %v733_v38, %v2408_v24 }
 0x7dc   :  { %v730_v40 = vpop.xlane.xlu0 %729 }
 0x7dd   :  { %v768_v15 = vrot.slane %v730_v40, %v2408_v24 }
 0x7de   :  { %v739_v46 = vpop.xlane.xlu1 %738 }
 0x7df   :  { %v790_v43 = vsel %vm789_vm5, %v768_v15, %v788_v41  ;;  %v780_v53 = vrot.slane %v739_v46, %v2408_v24 }
 0x7e0   :  { %v736_v45 = vpop.xlane.xlu0 %735  ;;  %v792_v49 = vsel %vm791_vm6, %v772_v44, %v790_v43 }
 0x7e1   :  { %v776_v47 = vrot.slane %v736_v45, %v2408_v24 }
 0x7e3   :  { %v794_v52 = vsel %vm793_vm7, %v776_v47, %v792_v49 }
 0x7e4   :  { %v742_v54 = vpop.xlane.xlu0 %741  ;;  %v796_v56 = vsel %vm795_vm8, %v780_v53, %v794_v52 }
 0x7e5   :  { %v784_v55 = vrot.slane %v742_v54, %v2408_v24 }
 0x7e7   :  { %v798_v57 = vsel %vm797_vm9, %v784_v55, %v796_v56 }
 0x7e8   :  { %v801_v58 = vsel %vm800_vm10, %v798_v57, -inf }
 0x7e9   :  { %802 = vmax.xlane.f32.xlu1 %v801_v58 }
 0x876   :  { %v803_v2 = vpop.xlane.xlu1 %802 }
 0x877   :  { %v808_v4 = vrot.slane %v803_v2, %v2353_v25  ;;  %v812_v5 = vrot.slane %v803_v2, %v811_v60  ;;  %v816_v6 = vrot.slane %v803_v2, %v815_v61  ;;  %v820_v11 = vrot.slane %v803_v2, %v819_v62 }
 0x878   :  { %v824_v19 = vrot.slane %v803_v2, %v823_v10 }
 0x879   :  { %v845_v8 = vsub.f32 %v721_v23, %v808_v4  ;;  %v846_v9 = vsub.f32 %v724_v27, %v812_v5  ;;  %v847_v12 = vsub.f32 %v727_v29, %v816_v6  ;;  %v848_v21 = vsub.f32 %v730_v40, %v820_v11 }
 0x87a   :  { %v831_v23 = vsub.s32 6, %v2347_v17  ;;  %v828_v27 = vrot.slane %v803_v2, %v827_v18  ;;  %v849_v28 = vsub.f32 %v733_v38, %v824_v19  ;;  %v835_v29 = vsub.s32 7, %v2347_v17 }
 0x87b   :  { %v853_v14 = vmul.f32 1.442695, %v845_v8  ;;  %v855_v16 = vmul.f32 1.442695, %v846_v9  ;;  %v857_v22 = vmul.f32 1.442695, %v847_v12 }
 0x87c   :  { %v859_v31 = vmul.f32 1.442695, %v848_v21  ;;  %v832_v32 = vrot.slane %v803_v2, %v831_v23  ;;  %v850_v37 = vsub.f32 %v736_v45, %v828_v27  ;;  %v861_v15 = vmul.f32 1.442695, %v849_v28 }
 0x87d   :  { %1635 = vpow2.f32 %v853_v14  ;;  %v836_v43 = vrot.slane %v803_v2, %v835_v29 }
 0x87e   :  { %1637 = vpow2.f32 %v855_v16  ;;  %v851_v44 = vsub.f32 %v739_v46, %v832_v32  ;;  %v863_v38 = vmul.f32 1.442695, %v850_v37 }
 0x87f   :  { %1639 = vpow2.f32 %v857_v22  ;;  %v852_v49 = vsub.f32 %v742_v54, %v836_v43 }
 0x880   :  { %1641 = vpow2.f32 %v859_v31  ;;  %v865_v52 = vmul.f32 1.442695, %v851_v44 }
 0x881   :  { %1643 = vpow2.f32 %v861_v15  ;;  %v867_v45 = vmul.f32 1.442695, %v852_v49 }
 0x882   :  { %1645 = vpow2.f32 %v863_v38 }
 0x883   :  { %1647 = vpow2.f32 %v865_v52 }
 0x884   :  { %1649 = vpow2.f32 %v867_v45 }
 0x887   :  { %v1636_v41 = vpop.eup %1635 }
 0x888   :  { %v1638_v40 = vpop.eup %1637  ;;  %878 = vperm.xlu0 %1600, %v1636_v41  }
 0x889   :  { %881 = vperm.xlu1 %1601, %v1638_v40   ;;  %v1640_v47 = vpop.eup %1639 }
 0x88a   :  { %v1642_v53 = vpop.eup %1641 }
 0x88b   :  { %v1644_v55 = vpop.eup %1643 }
 0x88c   :  { %v1646_v56 = vpop.eup %1645 }
 0x88d   :  { %884 = vperm.xlu1 %1601, %v1640_v47   ;;  %v1648_v57 = vpop.eup %1647 }
 0x88e   :  { %v1650_v58 = vpop.eup %1649 }
 0x891   :  { %887 = vperm.xlu1 %1601, %v1642_v53  }
 0x895   :  { %890 = vperm.xlu1 %1601, %v1644_v55  }
 0x899   :  { %893 = vperm.xlu1 %1601, %v1646_v56  }
 0x89d   :  { %896 = vperm.xlu1 %1601, %v1648_v57  }
 0x8a1   :  { %899 = vperm.xlu1 %1601, %v1650_v58  }
 0x907   :  { %v879_v54 = vpop.permute.xlu0 %878 }
 0x908   :  { %v882_v46 = vpop.permute.xlu1 %881  ;;  %v904_v8 = vrot.slane %v879_v54, %v2408_v24 }
 0x909   :  { %v908_v6 = vrot.slane %v882_v46, %v2408_v24 }
 0x90b   :  { %v933_v16 = vsel %vm785_vm3, %v908_v6, %v904_v8 }
 0x90c   :  { %v885_v59 = vpop.permute.xlu1 %884 }
 0x90d   :  { %v912_v9 = vrot.slane %v885_v59, %v2408_v24 }
 0x90f   :  { %v934_v21 = vsel %vm787_vm4, %v912_v9, %v933_v16 }
 0x910   :  { %v888_v2 = vpop.permute.xlu1 %887 }
 0x911   :  { %v916_v11 = vrot.slane %v888_v2, %v2408_v24 }
 0x913   :  { %v935_v27 = vsel %vm789_vm5, %v916_v11, %v934_v21 }
 0x914   :  { %v891_v4 = vpop.permute.xlu1 %890 }
 0x915   :  { %v920_v12 = vrot.slane %v891_v4, %v2408_v24 }
 0x917   :  { %v936_v28 = vsel %vm791_vm6, %v920_v12, %v935_v27 }
 0x918   :  { %v894_v5 = vpop.permute.xlu1 %893 }
 0x919   :  { %v924_v19 = vrot.slane %v894_v5, %v2408_v24 }
 0x91b   :  { %v937_v32 = vsel %vm793_vm7, %v924_v19, %v936_v28 }
 0x91c   :  { %v897_v14 = vpop.permute.xlu1 %896 }
 0x91d   :  { %v928_v22 = vrot.slane %v897_v14, %v2408_v24 }
 0x91f   :  { %v938_v15 = vsel %vm795_vm8, %v928_v22, %v937_v32 }
 0x920   :  { %v900_v31 = vpop.permute.xlu1 %899 }
 0x921   :  { %v932_v37 = vrot.slane %v900_v31, %v2408_v24 }
 0x923   :  { %v939_v43 = vsel %vm797_vm9, %v932_v37, %v938_v15 }
 0x924   :  { %v941_v44 = vsel %vm800_vm10, %v939_v43, 0.0 }
 0x925   :  { %942 = vadd.xlane.f32.xlu1 %v941_v44 }
 0x936   :  { %531 = vrot.lane.b32.xlu1 %v2331_v7, %s1996_s3 }
 0x9b2   :  { %v943_v38 = vpop.xlane.xlu1 %942 }
 0x9b3   :  { %1651 = vrcp.f32 %v943_v38 }
 0x9b6   :  { %v532_v49 = vpop.permute.xlu1 %531 }
 0x9b7   :  { %535 = vst.msk [vmem:[#allocation21 + $0x8] sm:$0xff] %vm228_vm2, %v532_v49 }
 0x9bd   :  { %v1652_v52 = vpop.eup %1651 }
 0x9be   :  { %v949_v45 = vrot.slane %v1652_v52, %v2353_v25  ;;  %v953_v24 = vrot.slane %v1652_v52, %v811_v60  ;;  %v957_v2 = vrot.slane %v1652_v52, %v815_v61  ;;  %v961_v7 = vrot.slane %v1652_v52, %v819_v62 }
 0x9bf   :  { %v965_v5 = vrot.slane %v1652_v52, %v823_v10  ;;  %v969_v60 = vrot.slane %v1652_v52, %v827_v18  ;;  %v973_v61 = vrot.slane %v1652_v52, %v831_v23  ;;  %v977_v62 = vrot.slane %v1652_v52, %v835_v29  ;;  %v1615_v10 = vld [vmem:[#allocation16] sm:$0xff]   ;;  %v1616_v18 = vld [vmem:[#allocation16 + $0x8] sm:$0xff]  }
 0x9c0   :  { %v986_v46 = vmul.f32 %v1636_v41, %v949_v45  ;;  %v987_v59 = vmul.f32 %v1638_v40, %v953_v24  ;;  %v988_v4 = vmul.f32 %v1640_v47, %v957_v2  ;;  %v989_v54 = vmul.f32 %v1642_v53, %v961_v7  ;;  %1549 = vmatpush3.bf16.msra.mxu0 %v1615_v10 }
 0x9c1   :  { %v990_v25 = vmul.f32 %v1644_v55, %v965_v5  ;;  %v991_v41 = vmul.f32 %v1646_v56, %v969_v60  ;;  %v992_v40 = vmul.f32 %v1648_v57, %v973_v61  ;;  %v993_v47 = vmul.f32 %v1650_v58, %v977_v62  ;;  %1550 = vmatprep.subr.bf16.mxu0 %v1994_v0 }
 0x9c2   :  { %996 = vperm.xlu0 %1600, %v986_v46  }
 0x9c4   :  { %1551 = vmatpush3.bf16.msra.mxu0 %v1616_v18 }
 0x9c6   :  { %1001 = vperm.xlu0 %1600, %v987_v59  }
 0x9ca   :  { %1006 = vperm.xlu0 %1600, %v988_v4  }
 0x9ce   :  { %1011 = vperm.xlu0 %1600, %v989_v54  }
 0x9d2   :  { %1016 = vperm.xlu0 %1600, %v990_v25  }
 0x9d6   :  { %1021 = vperm.xlu0 %1600, %v991_v41  }
 0x9da   :  { %1026 = vperm.xlu0 %1600, %v992_v40  }
 0x9de   :  { %1031 = vperm.xlu0 %1600, %v993_v47  }
 0x9e2   :  { %358 = vrot.lane.b32.xlu0 %v2308_v39, %s1996_s3 }
 0x9e6   :  { %363 = vrot.lane.b32.xlu0 %v2297_v30, %s1999_s10 }
 0x9ea   :  { %537 = vrot.lane.b32.xlu0 %v2319_v1, %s1999_s10 }
 0xa41   :  { %v997_v23 = vpop.permute.xlu0 %996 }
 0xa42   :  { %v1034_v29 = vmul.f32 %v1459_v33, %v997_v23 }
 0xa44   :  { %v1042_v30 = vsel %vm228_vm2, %v1034_v29, 0.0 }
 0xa45   :  { %v1002_v17 = vpop.permute.xlu0 %1001  ;;  %v1043_v58 = vrot.slane %v1042_v30, 4 }
 0xa46   :  { %v1035_v53 = vmul.f32 %v1460_v35, %v1002_v17 }
 0xa47   :  { %v1044_v11 = vadd.f32 %v1043_v58, %v1042_v30 }
 0xa48   :  { %v1049_v39 = vsel %vm228_vm2, %v1035_v53, 0.0 }
 0xa49   :  { %v1007_v55 = vpop.permute.xlu0 %1006  ;;  %v1050_v56 = vrot.slane %v1049_v39, 4  ;;  %v1045_v27 = vrot.slane %v1044_v11, 2 }
 0xa4a   :  { %v1036_v1 = vmul.f32 %v1463_v36, %v1007_v55 }
 0xa4b   :  { %v1051_v9 = vadd.f32 %v1050_v56, %v1049_v39  ;;  %v1046_v44 = vadd.f32 %v1045_v27, %v1044_v11 }
 0xa4c   :  { %v1056_v57 = vsel %vm228_vm2, %v1036_v1, 0.0 }
 0xa4d   :  { %v1057_v6 = vrot.slane %v1056_v57, 4  ;;  %v1012_v8 = vpop.permute.xlu0 %1011  ;;  %v1052_v36 = vrot.slane %v1051_v9, 2 }
 0xa4e   :  { %v1037_v33 = vmul.f32 %v1464_v50, %v1012_v8 }
 0xa4f   :  { %v1058_v20 = vadd.f32 %v1057_v6, %v1056_v57  ;;  %v1053_v32 = vadd.f32 %v1052_v36, %v1051_v9 }
 0xa50   :  { %v1063_v35 = vsel %vm228_vm2, %v1037_v33, 0.0 }
 0xa51   :  { %v1064_v12 = vrot.slane %v1063_v35, 4  ;;  %v1017_v14 = vpop.permute.xlu0 %1016  ;;  %v1059_v21 = vrot.slane %v1058_v20, 2  ;;  %v1054_v46 = vrot.slane %v1053_v32, 1 }
 0xa52   :  { %v1038_v16 = vmul.f32 %v1467_v42, %v1017_v14 }
 0xa53   :  { %v1065_v19 = vadd.f32 %v1064_v12, %v1063_v35  ;;  %v1060_v15 = vadd.f32 %v1059_v21, %v1058_v20  ;;  %v1055_v41 = vadd.f32 %v1054_v46, %v1053_v32 }
 0xa54   :  { %v1070_v22 = vsel %vm228_vm2, %v1038_v16, 0.0 }
 0xa55   :  { %v1066_v28 = vrot.slane %v1065_v19, 2  ;;  %v1071_v31 = vrot.slane %v1070_v22, 4  ;;  %v1022_v26 = vpop.permute.xlu0 %1021  ;;  %v1061_v59 = vrot.slane %v1060_v15, 1  ;;  %v1099_v39 = vpack.c.bf16 %v1055_v41, %v1055_v41 }
 0xa56   :  { %v1039_v50 = vmul.f32 %v1468_v3, %v1022_v26  ;;  %v1047_v3 = vrot.slane %v1046_v44, 1 }
 0xa57   :  { %v1072_v37 = vadd.f32 %v1071_v31, %v1070_v22  ;;  %v1067_v38 = vadd.f32 %v1066_v28, %v1065_v19  ;;  %v1062_v40 = vadd.f32 %v1061_v59, %v1060_v15  ;;  %v1179_v33 = vunpack.c.l.b16 %v1099_v39 }
 0xa58   :  { %v1077_v43 = vsel %vm228_vm2, %v1039_v50, 0.0  ;;  %v1048_v47 = vadd.f32 %v1047_v3, %v1046_v44 }
 0xa59   :  { %v1073_v42 = vrot.slane %v1072_v37, 2  ;;  %v1027_v49 = vpop.permute.xlu0 %1026  ;;  %v1078_v52 = vrot.slane %v1077_v43, 4  ;;  %v1068_v4 = vrot.slane %v1067_v38, 1  ;;  %v1100_v51 = vpack.c.bf16 %v1062_v40, %v1062_v40 }
 0xa5a   :  { %v1040_v45 = vmul.f32 %v1471_v63, %v1027_v49  ;;  %v1098_v1 = vpack.c.bf16 %v1048_v47, %v1048_v47  ;;  %v1617_v49 = vld [vmem:[%s2589_s13] sm:$0xff]  }
 0xa5b   :  { %v1074_v24 = vadd.f32 %v1073_v42, %v1072_v37  ;;  %v1079_v2 = vadd.f32 %v1078_v52, %v1077_v43  ;;  %v1069_v10 = vadd.f32 %v1068_v4, %v1067_v38  ;;  %v1180_v11 = vunpack.c.l.b16 %v1100_v51  ;;  %1565 = vmatpush3.bf16.msra.mxu1 %v1617_v49  ;;  %v1618_v52 = vld [vmem:[%s2589_s13 + $0x8] sm:$0xff]  }
 0xa5c   :  { %v1084_v34 = vsel %vm228_vm2, %v1040_v45, 0.0  ;;  %v1178_v12 = vunpack.c.l.b16 %v1098_v1  ;;  %1566 = vmatprep.subr.bf16.mxu1 %v1994_v0 }
 0xa5d   :  { %v1085_v7 = vrot.slane %v1084_v34, 4  ;;  %v1032_v54 = vpop.permute.xlu0 %1031  ;;  %v1075_v5 = vrot.slane %v1074_v24, 1  ;;  %v1080_v25 = vrot.slane %v1079_v2, 2  ;;  %v1101_v56 = vpack.c.bf16 %v1069_v10, %v1069_v10 }
 0xa5e   :  { %v1041_v60 = vmul.f32 %v1472_v13, %v1032_v54  ;;  %v1186_v22 = vsel %vm785_vm3, %v1179_v33, %v1178_v12 }
 0xa5f   :  { %v1086_v61 = vadd.f32 %v1085_v7, %v1084_v34  ;;  %v1081_v62 = vadd.f32 %v1080_v25, %v1079_v2  ;;  %v1076_v29 = vadd.f32 %v1075_v5, %v1074_v24  ;;  %v1181_v14 = vunpack.c.l.b16 %v1101_v56  ;;  %1567 = vmatpush3.bf16.msra.mxu1 %v1618_v52 }
 0xa60   :  { %v1091_v63 = vsel %vm228_vm2, %v1041_v60, 0.0  ;;  %v1187_v31 = vsel %vm787_vm4, %v1180_v11, %v1186_v22 }
 0xa61   :  { %v1087_v18 = vrot.slane %v1086_v61, 2  ;;  %v1092_v23 = vrot.slane %v1091_v63, 4  ;;  %v359_v17 = vpop.permute.xlu0 %358  ;;  %v1082_v53 = vrot.slane %v1081_v62, 1  ;;  %v1102_v8 = vpack.c.bf16 %v1076_v29, %v1076_v29 }
 0xa62   :  { %361 = vst.msk [vmem:[#allocation21] sm:$0xff] %vm228_vm2, %v359_v17  ;;  %v1188_v50 = vsel %vm789_vm5, %v1181_v14, %v1187_v31 }
 0xa63   :  { %v1088_v55 = vadd.f32 %v1087_v18, %v1086_v61  ;;  %v1093_v30 = vadd.f32 %v1092_v23, %v1091_v63  ;;  %v1083_v13 = vadd.f32 %v1082_v53, %v1081_v62  ;;  %v1182_v21 = vunpack.c.l.b16 %v1102_v8 }
 0xa65   :  { %v1089_v57 = vrot.slane %v1088_v55, 1  ;;  %v1094_v58 = vrot.slane %v1093_v30, 2  ;;  %v364_v6 = vpop.permute.xlu0 %363  ;;  %v1103_v9 = vpack.c.bf16 %v1083_v13, %v1083_v13  ;;  %v1189_v37 = vsel %vm791_vm6, %v1182_v21, %v1188_v50 }
 0xa66   :  { %366 = vst.msk [vmem:[#allocation23] sm:$0xff] %vm228_vm2, %v364_v6 }
 0xa67   :  { %v1090_v20 = vadd.f32 %v1089_v57, %v1088_v55  ;;  %v1095_v35 = vadd.f32 %v1094_v58, %v1093_v30  ;;  %v1183_v27 = vunpack.c.l.b16 %v1103_v9 }
 0xa69   :  { %v1104_v16 = vpack.c.bf16 %v1090_v20, %v1090_v20  ;;  %v1096_v36 = vrot.slane %v1095_v35, 1  ;;  %v538_v19 = vpop.permute.xlu0 %537  ;;  %v1190_v15 = vsel %vm793_vm7, %v1183_v27, %v1189_v37 }
 0xa6a   :  { %541 = vst.msk [vmem:[#allocation23 + $0x8] sm:$0xff] %vm228_vm2, %v538_v19 }
 0xa6b   :  { %v1097_v28 = vadd.f32 %v1096_v36, %v1095_v35  ;;  %v1184_v26 = vunpack.c.l.b16 %v1104_v16 }
 0xa6d   :  { %v1105_v32 = vpack.c.bf16 %v1097_v28, %v1097_v28  ;;  %v1191_v44 = vsel %vm795_vm8, %v1184_v26, %v1190_v15 }
 0xa6f   :  { %v1185_v43 = vunpack.c.l.b16 %v1105_v32 }
 0xa71   :  { %v1192_v38 = vsel %vm797_vm9, %v1185_v43, %v1191_v44 }
 0xa72   :  { %v1193_v42 = vpack.c.b16 %v1192_v38, %v1192_v38 }
 0xa74   :  { %1553 = vmatmul.mubr.msk.bf16.vlgmr.msra.gmra.mrb[8].mxu0 %vm228_vm2, %v1193_v42 }
 0xb47   :  { %v1243_v45 = vpop.f32.mrb[8].mxu0 }
 0xb48   :  { %1653 = vtanh.f32 %v1243_v45  ;;  %v1554_v46 = vpop.f32.mrb[9].mxu0 }
 0xb49   :  { %v1246_v24 = vpop.f32.mrb[10].mxu0 }
 0xb4a   :  { %v1555_v59 = vpop.f32.mrb[11].mxu0 }
 0xb52   :  { %v1654_v2 = vpop.eup %1653 }
 0xb53   :  { %v1250_v34 = vpack.c.bf16 %v1654_v2, %v1654_v2 }
 0xb55   :  { %1569 = vmatmul.mubr.msk.bf16.vlgmr.msra.gmra.mrb[16].mxu1 %vm228_vm2, %v1250_v34 }
 0xb56   :  { %1908 = shalt.err (!%p1905_p8)
}
 0xb57   :  { %s1909_s29 = scalar_lea.hbm %s2593_s17, 256 }
 0xb58   :  { %p1910_p9 = scmp.ne.s32.totalorder %s2593_s17, %s1909_s29  ;;  %p1913_p10 = scmp.lt.u32.totalorder %s1909_s29, %s2593_s17 }
 0xb5a   :  { %p1915_p11 = pnand %p1913_p10, %p1910_p9 }
 0xb5c   :  { %1918 = shalt.err (!%p1915_p11)
}
 0xb5d   :  { %1396 = dma.vmem_to_hbm [thread:$0]  %s1391_s4, 256, %s2593_s17, [#allocation22], %s2611_s23, %s2611_s23, %s2610_s30  }
 0xb5e   :  { %s2001_s26 = smov [#allocation23]  }
 0xb5f   :  { %s1402_s25 = sshll.u32 %s2001_s26, 4  ;;  %s1403_s25 = int_to_ptr.vmem [resolvable:$true] %s1402_s25 }
 0xb60   :  { %s1919_s5 = scalar_lea.vmem %s1403_s25, 256  ;;  %p1924_p13 = scmp.lt.s32.totalorder %s1403_s25, %s1403_s25 }
 0xb61   :  { %p1920_p12 = scmp.ne.s32.totalorder %s1403_s25, %s1919_s5  ;;  %p1925_p0 = scmp.lt.s32.totalorder %s1919_s5, %s1919_s5 }
 0xb63   :  { %p1926_p1 = por %p1925_p0, %p1924_p13 }
 0xb65   :  { %p1927_p2 = pnand %p1926_p1, %p1920_p12 }
 0xb67   :  { %1930 = shalt.err (!%p1927_p2)
}
 0xb68   :  { %s1931_s6 = scalar_lea.hbm %s2594_s18, 256 }
 0xb69   :  { %p1932_p3 = scmp.ne.s32.totalorder %s2594_s18, %s1931_s6  ;;  %p1935_p4 = scmp.lt.u32.totalorder %s1931_s6, %s2594_s18 }
 0xb6b   :  { %p1937_p5 = pnand %p1935_p4, %p1932_p3 }
 0xb6d   :  { %1940 = shalt.err (!%p1937_p5)
}
 0xb6e   :  { %1408 = dma.vmem_to_hbm [thread:$0]  %s1403_s25, 256, %s2594_s18, [#allocation22], %s2611_s23, %s2611_s23, %s2610_s30  }
 0xb6f   :  { %v1456_v3 = vld [vmem:[%s2591_s15] ss:$0 sm:$0xff]  ;;  %s2002_s21 = smov [#allocation20]  }
 0xb70   :  { %s1381_s7 = sshll.u32 %s2002_s21, 4  ;;  %s1382_s7 = int_to_ptr.vmem [resolvable:$true] %s1381_s7 }
 0xb71   :  { %s1941_s4 = scalar_lea.vmem %s1382_s7, 128  ;;  %p1946_p7 = scmp.lt.s32.totalorder %s1382_s7, %s1382_s7 }
 0xb72   :  { %p1942_p6 = scmp.ne.s32.totalorder %s1382_s7, %s1941_s4  ;;  %p1947_p8 = scmp.lt.s32.totalorder %s1941_s4, %s1941_s4 }
 0xb74   :  { %p1948_p9 = por %p1947_p8, %p1946_p7 }
 0xb76   :  { %p1949_p10 = pnand %p1948_p9, %p1942_p6 }
 0xc28   :  { %v1360_v0 = vpop.f32.mrb[16].mxu1 }
 0xc29   :  { %v1361_v4 = vadd.f32 %v1360_v0, %v2371_v48  ;;  %v1570_v7 = vpop.f32.mrb[17].mxu1 }
 0xc2a   :  { %v1363_v54 = vpop.f32.mrb[18].mxu1 }
 0xc2b   :  { %v1373_v5 = vadd.f32 %v1456_v3, %v1361_v4  ;;  %v1571_v25 = vpop.f32.mrb[19].mxu1 }
 0xc2d   :  { %1374 = vst [vmem:[#allocation20] sm:$0xff] %v1373_v5 }
 0xc2e   :  { %1952 = shalt.err (!%p1949_p10)
}
 0xc2f   :  { %s2612_s15 = sld [smem:[#allocation35_spill]] }
 0xc35   :  { %s1953_s23 = scalar_lea.hbm %s2612_s15, 128 }
 0xc36   :  { %p1954_p11 = scmp.ne.s32.totalorder %s2612_s15, %s1953_s23  ;;  %p1957_p12 = scmp.lt.u32.totalorder %s1953_s23, %s2612_s15 }
 0xc38   :  { %p1959_p13 = pnand %p1957_p12, %p1954_p11 }
 0xc3a   :  { %1962 = shalt.err (!%p1959_p13)
}
 0xc3b   :  { %1384 = dma.vmem_to_hbm [thread:$0]  %s1382_s7, 128, %s2612_s15, [#allocation4]  }
 0xc3c   :  { %1975 = dma.done.wait [#allocation4], 128  }
 0xc3d   :  { %1976 = vsyncadd [#allocation4], 4294967168 }
 0xc3e   :  { %1977 = dma.done.wait [#allocation22], 512  }
 0xc3f   :  { %1978 = vsyncadd [#allocation22], 4294966784 }
 0xc40   :  { %1418 = vsyncpa [#allocation3], 1 }
 0xc41   :  { %1419 = vsyncpa [#allocation6], 1 }
 0xc42   :  { %1420 = vsyncpa [#allocation9], 1 }
 0xc43   :  { %1421 = vsyncpa [#allocation12], 1 }
 0xc44   :  { %1422 = vsyncpa [#allocation15], 1 }
 0xc45   :  { %1423 = vsyncpa [#allocation18], 1 }
 0xc46   :  { %1424 = vsyncpa [#allocation4], 1 }
 0xc47   :  { %1425 = vsyncpa [#allocation22], 1 }

</bundles_post_ra>
